<compile_context>
chip_gen: v7x
topology: tpu7x:2x2x1
jax: 0.10.0
libtpu: 0.0.40
codegen_flags: <defaults>
</compile_context>

<pallas_src>
import jax
import jax.numpy as jnp
from jax.experimental import pallas as pl
from jax.experimental.pallas import tpu as pltpu


def _round_up(x, m):
    return ((x + m - 1) // m) * m


def _cnn_news_kernel(x_ref, bias_ref, convw_ref, convb_ref,
                     aw1_ref, ab1_ref, av2_ref, out_ref):
    # x_ref:     (TB, L+2p, D) bf16  embedded words, zero-padded along L ('same' conv)
    # bias_ref:  (TB, L)       f32   additive attention mask bias (0 keep / -1e9 pad)
    # convw_ref: (K, D, Cp)    bf16  Conv1d weight (channel dim zero-padded to Cp)
    # convb_ref: (1, Cp)       f32   Conv1d bias
    # aw1_ref:   (Cp, A)       bf16  attention affine1 weight
    # ab1_ref:   (1, A)        f32   attention affine1 bias
    # av2_ref:   (1, 1, A)     f32   attention context vector (affine2, no bias)
    # out_ref:   (TB, Cp)      f32   pooled news representations (lane-dense)
    TB, Lp, D = x_ref.shape
    K = convw_ref.shape[0]
    Cp = convw_ref.shape[2]
    L = bias_ref.shape[1]
    A = aw1_ref.shape[1]

    # --- Conv1D ('same' padding) + ReLU: K shifted windows of the padded
    # block, each one aligned (TB*L, D) @ (D, Cp) MXU matmul, f32 accumulation.
    h = jnp.dot(x_ref[:, 0:L, :].reshape(TB * L, D), convw_ref[0],
                preferred_element_type=jnp.float32)
    for k in range(1, K):                       # K is small and static -> unrolled
        h = h + jnp.dot(x_ref[:, k:k + L, :].reshape(TB * L, D), convw_ref[k],
                        preferred_element_type=jnp.float32)
    h = jnp.maximum(h + convb_ref[...], 0.0)                    # (TB*L, Cp) f32

    # --- additive attention ---
    att = jnp.tanh(jnp.dot(h.astype(jnp.bfloat16), aw1_ref[...],
                           preferred_element_type=jnp.float32)
                   + ab1_ref[...])                              # (TB*L, A) f32

    # context score = att . v2 as a VPU multiply + lane reduce (no N=1 matvec)
    scores = jnp.sum(att.reshape(TB, L, A) * av2_ref[...], axis=-1)  # (TB, L)
    scores = scores + bias_ref[...]                              # additive mask

    # masked softmax over the sequence on a lane-dense (TB, L) slab
    m = jnp.max(scores, axis=-1, keepdims=True)                  # (TB, 1)
    e = jnp.exp(scores - m)                                      # (TB, L)
    denom = jnp.sum(e, axis=-1, keepdims=True)                   # (TB, 1)
    alpha = e * pl.reciprocal(denom, approx=True)                # (TB, L)

    pooled = jnp.sum(h.reshape(TB, L, Cp) * alpha[:, :, None], axis=1)  # (TB, Cp)
    out_ref[...] = pooled.astype(out_ref.dtype)


def cnn_news_encoder(title_text, title_mask, params, tb=32):
    """title_text: [B, N, L] int32 tokens; title_mask: [B, N, L] float mask."""
    B, N, L = title_text.shape
    emb = params["embedding"]                                   # (V, D) f32
    D = emb.shape[1]
    conv_w = params["conv_w"]                                   # (K, D, C)
    K, _, C = conv_w.shape
    A = params["att_w1"].shape[1]
    BN = B * N
    p = (K - 1) // 2                 # 'same' padding (odd window, as reference)
    Lp = L + 2 * p

    # Per-step batch: clamp so tiny inputs still fit one block; production
    # shapes should sweep tb in {32, 64, 128} (halve on v7x's 64 MiB VMEM).
    tb = max(8, min(_round_up(tb, 8), _round_up(BN, 8)))
    BN_pad = _round_up(BN, tb)
    Cp = _round_up(C, 128)           # lane-dense channel padding

    # --- XLA glue: gather f32 rows, cast only the gathered slab to bf16;
    # zero-pad the sequence for the conv and the batch up to tb. ---
    w = emb[title_text.reshape(BN, L)].astype(jnp.bfloat16)     # (BN, L, D)
    w = jnp.pad(w, ((0, BN_pad - BN), (p, p), (0, 0)))          # (BN_pad, Lp, D)

    # additive attention-mask bias; padded items are fully masked (safe, sliced off)
    mask = jnp.pad(title_mask.reshape(BN, L).astype(jnp.float32),
                   ((0, BN_pad - BN), (0, 0)))
    bias = (mask - 1.0) * 1e9                                   # (BN_pad, L)

    # Parameters; channel dim zero-padded to Cp so every store is lane-dense.
    conv_w_p = jnp.pad(conv_w, ((0, 0), (0, 0), (0, Cp - C))).astype(jnp.bfloat16)
    conv_b_p = jnp.pad(params["conv_b"].reshape(1, C),
                       ((0, 0), (0, Cp - C))).astype(jnp.float32)
    att_w1_p = jnp.pad(params["att_w1"], ((0, Cp - C), (0, 0))).astype(jnp.bfloat16)
    att_b1 = params["att_b1"].reshape(1, A).astype(jnp.float32)
    att_v2 = params["att_v2"].reshape(1, 1, A).astype(jnp.float32)

    out = pl.pallas_call(
        _cnn_news_kernel,
        out_shape=jax.ShapeDtypeStruct((BN_pad, Cp), jnp.float32),
        grid_spec=pltpu.PrefetchScalarGridSpec(
            num_scalar_prefetch=0,
            grid=(BN_pad // tb,),
            in_specs=[
                pl.BlockSpec((tb, Lp, D), lambda i: (i, 0, 0)),   # embedded words
                pl.BlockSpec((tb, L), lambda i: (i, 0)),          # mask bias
                pl.BlockSpec((K, D, Cp), lambda i: (0, 0, 0)),    # conv weight
                pl.BlockSpec((1, Cp), lambda i: (0, 0)),          # conv bias
                pl.BlockSpec((Cp, A), lambda i: (0, 0)),          # attn affine1 W
                pl.BlockSpec((1, A), lambda i: (0, 0)),           # attn affine1 b
                pl.BlockSpec((1, 1, A), lambda i: (0, 0, 0)),     # attn context v
            ],
            out_specs=pl.BlockSpec((tb, Cp), lambda i: (i, 0)),   # lane-dense 2D
        ),
        compiler_params=pltpu.CompilerParams(
            dimension_semantics=("parallel",)),
    )(w, bias, conv_w_p, conv_b_p, att_w1_p, att_b1, att_v2)

    return out[:BN, :C].reshape(B, N, C)


def cnn_news_encoder_reference(title_text, title_mask, params):
    """Pure-JAX f32 reference matching the PyTorch module semantics."""
    B, N, L = title_text.shape
    conv_w = params["conv_w"]
    K, D, C = conv_w.shape
    p = (K - 1) // 2
    BN = B * N
    w = params["embedding"][title_text.reshape(BN, L)]          # (BN, L, D)
    wpad = jnp.pad(w, ((0, 0), (p, p), (0, 0)))
    h = jnp.broadcast_to(params["conv_b"].reshape(1, 1, C), (BN, L, C))
    for k in range(K):
        h = h + jnp.einsum("bld,dc->blc", wpad[:, k:k + L, :], conv_w[k])
    h = jnp.maximum(h, 0.0)
    att = jnp.tanh(jnp.einsum("blc,ca->bla", h, params["att_w1"])
                   + params["att_b1"].reshape(1, 1, -1))
    scores = jnp.einsum("bla,a->bl", att, params["att_v2"].reshape(-1))
    mask = title_mask.reshape(BN, L)
    scores = jnp.where(mask == 0.0, -1e9, scores)
    alpha = jax.nn.softmax(scores, axis=-1)
    pooled = jnp.einsum("bl,blc->bc", alpha, h)
    return pooled.reshape(B, N, C)


def init_params(key, vocab_size, embed_dim, kernel_num, window_size, attn_dim):
    # Deterministic synthetic parameters (no checkpoint / pickle load).
    k = jax.random.split(key, 6)
    scale = 0.1
    return {
        "embedding": scale * jax.random.normal(k[0], (vocab_size, embed_dim), jnp.float32),
        "conv_w":    scale * jax.random.normal(k[1], (window_size, embed_dim, kernel_num), jnp.float32),
        "conv_b":    scale * jax.random.normal(k[2], (1, kernel_num), jnp.float32),
        "att_w1":    scale * jax.random.normal(k[3], (kernel_num, attn_dim), jnp.float32),
        "att_b1":    scale * jax.random.normal(k[4], (1, attn_dim), jnp.float32),
        "att_v2":    scale * jax.random.normal(k[5], (attn_dim, 1), jnp.float32),
    }


if __name__ == "__main__":
    # Small config consistent with the module:
    #   batch=2, news_num=3, max_title_length=16, word_embedding_dim=32,
    #   cnn_kernel_num=32, cnn_window_size=3, attention_dim=16, vocab=50.
    B, N, L = 2, 3, 16
    V, D, C, K, A = 50, 32, 32, 3, 16

    root = jax.random.PRNGKey(0)
    kp, kt, kl = jax.random.split(root, 3)

    params = init_params(kp, V, D, C, K, A)

    title_text = jax.random.randint(kt, (B, N, L), 0, V, dtype=jnp.int32)
    # Variable-length titles: positions < length are valid (mask=1), rest padded.
    lengths = jax.random.randint(kl, (B, N, 1), 4, L + 1)
    title_mask = (jnp.arange(L)[None, None, :] < lengths).astype(jnp.float32)

    news_repr = cnn_news_encoder(title_text, title_mask, params, tb=32)
    jax.block_until_ready(news_repr)
    assert news_repr.shape == (B, N, C)
    assert bool(jnp.all(jnp.isfinite(news_repr)))

    # Loose tolerance: bf16 MXU operands + approx reciprocal vs f32 reference.
    ref = cnn_news_encoder_reference(title_text, title_mask, params)
    assert bool(jnp.allclose(news_repr, ref, rtol=5e-2, atol=5e-2))

    print("KERNEL_OK")
</pallas_src>

<mosaic_0001>
module attributes {stable_mosaic.version = 11 : i64} {
  func.func @_cnn_news_kernel(%arg0: i32, %arg1: memref<8x18x32xbf16, #tpu.memory_space<vmem>>, %arg2: memref<8x16xf32, #tpu.memory_space<vmem>>, %arg3: memref<3x32x128xbf16, #tpu.memory_space<vmem>>, %arg4: memref<1x128xf32, #tpu.memory_space<vmem>>, %arg5: memref<128x16xbf16, #tpu.memory_space<vmem>>, %arg6: memref<1x16xf32, #tpu.memory_space<vmem>>, %arg7: memref<1x1x16xf32, #tpu.memory_space<vmem>>, %arg8: memref<8x128xf32, #tpu.memory_space<vmem>>) attributes {dimension_semantics = [#tpu.dimension_semantics<parallel>], iteration_bounds = array<i64: 1>, scalar_prefetch = 0 : i64, scratch_operands = 0 : i64, tpu.core_type = #tpu.core_type<tc>, window_params = [{transform_indices = @transform_0, window_bounds = array<i64: 8, 18, 32>}, {transform_indices = @transform_1, window_bounds = array<i64: 8, 16>}, {pipeline_mode = #tpu.pipeline_mode<synchronous>, transform_indices = @transform_2, window_bounds = array<i64: 3, 32, 128>}, {pipeline_mode = #tpu.pipeline_mode<synchronous>, transform_indices = @transform_3, window_bounds = array<i64: 1, 128>}, {pipeline_mode = #tpu.pipeline_mode<synchronous>, transform_indices = @transform_4, window_bounds = array<i64: 128, 16>}, {pipeline_mode = #tpu.pipeline_mode<synchronous>, transform_indices = @transform_5, window_bounds = array<i64: 1, 16>}, {pipeline_mode = #tpu.pipeline_mode<synchronous>, transform_indices = @transform_6, window_bounds = array<i64: 1, 1, 16>}, {transform_indices = @transform_7, window_bounds = array<i64: 8, 128>}]} {
    %c0 = arith.constant 0 : index
    %c0_0 = arith.constant 0 : index
    %c0_1 = arith.constant 0 : index
    %0 = vector.load %arg1[%c0, %c0_0, %c0_1] : memref<8x18x32xbf16, #tpu.memory_space<vmem>>, vector<8x16x32xbf16>
    %1 = vector.shape_cast %0 : vector<8x16x32xbf16> to vector<128x32xbf16>
    %c0_2 = arith.constant 0 : index
    %c0_3 = arith.constant 0 : index
    %c0_4 = arith.constant 0 : index
    %2 = vector.load %arg3[%c0_2, %c0_3, %c0_4] : memref<3x32x128xbf16, #tpu.memory_space<vmem>>, vector<1x32x128xbf16>
    %3 = vector.shape_cast %2 : vector<1x32x128xbf16> to vector<32x128xbf16>
    %cst = arith.constant dense<0.000000e+00> : vector<128x128xf32>
    %4 = tpu.matmul %1, %3, %cst {dimension_numbers = #tpu.dot_dimension_numbers<[1], [0], [0], [1], [0, 0, 1, 1], [], []>} : vector<128x32xbf16>, vector<32x128xbf16>, vector<128x128xf32> -> vector<128x128xf32>
    %c0_5 = arith.constant 0 : index
    %c1 = arith.constant 1 : index
    %c0_6 = arith.constant 0 : index
    %5 = vector.load %arg1[%c0_5, %c1, %c0_6] : memref<8x18x32xbf16, #tpu.memory_space<vmem>>, vector<8x16x32xbf16>
    %6 = vector.shape_cast %5 : vector<8x16x32xbf16> to vector<128x32xbf16>
    %c1_7 = arith.constant 1 : index
    %c0_8 = arith.constant 0 : index
    %c0_9 = arith.constant 0 : index
    %7 = vector.load %arg3[%c1_7, %c0_8, %c0_9] : memref<3x32x128xbf16, #tpu.memory_space<vmem>>, vector<1x32x128xbf16>
    %8 = vector.shape_cast %7 : vector<1x32x128xbf16> to vector<32x128xbf16>
    %cst_10 = arith.constant dense<0.000000e+00> : vector<128x128xf32>
    %9 = tpu.matmul %6, %8, %cst_10 {dimension_numbers = #tpu.dot_dimension_numbers<[1], [0], [0], [1], [0, 0, 1, 1], [], []>} : vector<128x32xbf16>, vector<32x128xbf16>, vector<128x128xf32> -> vector<128x128xf32>
    %10 = arith.addf %4, %9 : vector<128x128xf32>
    %c0_11 = arith.constant 0 : index
    %c2 = arith.constant 2 : index
    %c0_12 = arith.constant 0 : index
    %11 = vector.load %arg1[%c0_11, %c2, %c0_12] : memref<8x18x32xbf16, #tpu.memory_space<vmem>>, vector<8x16x32xbf16>
    %12 = vector.shape_cast %11 : vector<8x16x32xbf16> to vector<128x32xbf16>
    %c2_13 = arith.constant 2 : index
    %c0_14 = arith.constant 0 : index
    %c0_15 = arith.constant 0 : index
    %13 = vector.load %arg3[%c2_13, %c0_14, %c0_15] : memref<3x32x128xbf16, #tpu.memory_space<vmem>>, vector<1x32x128xbf16>
    %14 = vector.shape_cast %13 : vector<1x32x128xbf16> to vector<32x128xbf16>
    %cst_16 = arith.constant dense<0.000000e+00> : vector<128x128xf32>
    %15 = tpu.matmul %12, %14, %cst_16 {dimension_numbers = #tpu.dot_dimension_numbers<[1], [0], [0], [1], [0, 0, 1, 1], [], []>} : vector<128x32xbf16>, vector<32x128xbf16>, vector<128x128xf32> -> vector<128x128xf32>
    %16 = arith.addf %10, %15 : vector<128x128xf32>
    %c0_17 = arith.constant 0 : index
    %c0_18 = arith.constant 0 : index
    %17 = vector.load %arg4[%c0_17, %c0_18] : memref<1x128xf32, #tpu.memory_space<vmem>>, vector<1x128xf32>
    %18 = vector.broadcast %17 : vector<1x128xf32> to vector<128x128xf32>
    %19 = arith.addf %16, %18 : vector<128x128xf32>
    %cst_19 = arith.constant 0.000000e+00 : f32
    %20 = vector.broadcast %cst_19 : f32 to vector<128x128xf32>
    %21 = arith.maximumf %19, %20 : vector<128x128xf32>
    %22 = arith.truncf %21 : vector<128x128xf32> to vector<128x128xbf16>
    %c0_20 = arith.constant 0 : index
    %c0_21 = arith.constant 0 : index
    %23 = vector.load %arg5[%c0_20, %c0_21] : memref<128x16xbf16, #tpu.memory_space<vmem>>, vector<128x16xbf16>
    %cst_22 = arith.constant dense<0.000000e+00> : vector<128x16xf32>
    %24 = tpu.matmul %22, %23, %cst_22 {dimension_numbers = #tpu.dot_dimension_numbers<[1], [0], [0], [1], [0, 0, 1, 1], [], []>} : vector<128x128xbf16>, vector<128x16xbf16>, vector<128x16xf32> -> vector<128x16xf32>
    %c0_23 = arith.constant 0 : index
    %c0_24 = arith.constant 0 : index
    %25 = vector.load %arg6[%c0_23, %c0_24] : memref<1x16xf32, #tpu.memory_space<vmem>>, vector<1x16xf32>
    %26 = vector.broadcast %25 : vector<1x16xf32> to vector<128x16xf32>
    %27 = arith.addf %24, %26 : vector<128x16xf32>
    %28 = math.tanh %27 : vector<128x16xf32>
    %29 = vector.shape_cast %28 : vector<128x16xf32> to vector<8x16x16xf32>
    %c0_25 = arith.constant 0 : index
    %c0_26 = arith.constant 0 : index
    %c0_27 = arith.constant 0 : index
    %30 = vector.load %arg7[%c0_25, %c0_26, %c0_27] : memref<1x1x16xf32, #tpu.memory_space<vmem>>, vector<1x1x16xf32>
    %31 = vector.broadcast %30 : vector<1x1x16xf32> to vector<8x16x16xf32>
    %32 = arith.mulf %29, %31 : vector<8x16x16xf32>
    %cst_28 = arith.constant dense<0.000000e+00> : vector<8x16xf32>
    %33 = vector.multi_reduction <add>, %32, %cst_28 [2] : vector<8x16x16xf32> to vector<8x16xf32>
    %c0_29 = arith.constant 0 : index
    %c0_30 = arith.constant 0 : index
    %34 = vector.load %arg2[%c0_29, %c0_30] : memref<8x16xf32, #tpu.memory_space<vmem>>, vector<8x16xf32>
    %35 = arith.addf %33, %34 : vector<8x16xf32>
    %cst_31 = arith.constant dense<0xFF800000> : vector<8xf32>
    %36 = vector.multi_reduction <maximumf>, %35, %cst_31 [1] : vector<8x16xf32> to vector<8xf32>
    %37 = vector.shape_cast %36 : vector<8xf32> to vector<8x1xf32>
    %38 = vector.broadcast %37 : vector<8x1xf32> to vector<8x16xf32>
    %39 = arith.subf %35, %38 : vector<8x16xf32>
    %40 = math.exp %39 : vector<8x16xf32>
    %cst_32 = arith.constant dense<0.000000e+00> : vector<8xf32>
    %41 = vector.multi_reduction <add>, %40, %cst_32 [1] : vector<8x16xf32> to vector<8xf32>
    %42 = vector.shape_cast %41 : vector<8xf32> to vector<8x1xf32>
    %43 = tpu.reciprocal %42 {approx = true} : vector<8x1xf32> -> vector<8x1xf32>
    %44 = vector.broadcast %43 : vector<8x1xf32> to vector<8x16xf32>
    %45 = arith.mulf %40, %44 : vector<8x16xf32>
    %46 = vector.shape_cast %21 : vector<128x128xf32> to vector<8x16x128xf32>
    %47 = vector.shape_cast %45 : vector<8x16xf32> to vector<8x16x1xf32>
    %48 = vector.broadcast %47 : vector<8x16x1xf32> to vector<8x16x128xf32>
    %49 = arith.mulf %46, %48 : vector<8x16x128xf32>
    %cst_33 = arith.constant dense<0.000000e+00> : vector<8x128xf32>
    %50 = vector.multi_reduction <add>, %49, %cst_33 [1] : vector<8x16x128xf32> to vector<8x128xf32>
    %c0_34 = arith.constant 0 : index
    %c0_35 = arith.constant 0 : index
    %51 = vector.load %arg8[%c0_34, %c0_35] : memref<8x128xf32, #tpu.memory_space<vmem>>, vector<8x128xf32>
    tpu.vector_store %arg8[%c0_34, %c0_35], %50 {strides = array<i32>} : memref<8x128xf32, #tpu.memory_space<vmem>>, vector<8x128xf32>,
    return
  }
  func.func @transform_0(%arg0: i32) -> (i32, i32, i32) {
    %c0_i32 = arith.constant 0 : i32
    %c0_i32_0 = arith.constant 0 : i32
    %c0_i32_1 = arith.constant 0 : i32
    return %arg0, %c0_i32, %c0_i32_0 : i32, i32, i32
  }
  func.func @transform_1(%arg0: i32) -> (i32, i32) {
    %c0_i32 = arith.constant 0 : i32
    %c0_i32_0 = arith.constant 0 : i32
    return %arg0, %c0_i32 : i32, i32
  }
  func.func @transform_2(%arg0: i32) -> (i32, i32, i32) {
    %c0_i32 = arith.constant 0 : i32
    %c0_i32_0 = arith.constant 0 : i32
    %c0_i32_1 = arith.constant 0 : i32
    %c0_i32_2 = arith.constant 0 : i32
    return %c0_i32, %c0_i32_0, %c0_i32_1 : i32, i32, i32
  }
  func.func @transform_3(%arg0: i32) -> (i32, i32) {
    %c0_i32 = arith.constant 0 : i32
    %c0_i32_0 = arith.constant 0 : i32
    %c0_i32_1 = arith.constant 0 : i32
    return %c0_i32, %c0_i32_0 : i32, i32
  }
  func.func @transform_4(%arg0: i32) -> (i32, i32) {
    %c0_i32 = arith.constant 0 : i32
    %c0_i32_0 = arith.constant 0 : i32
    %c0_i32_1 = arith.constant 0 : i32
    return %c0_i32, %c0_i32_0 : i32, i32
  }
  func.func @transform_5(%arg0: i32) -> (i32, i32) {
    %c0_i32 = arith.constant 0 : i32
    %c0_i32_0 = arith.constant 0 : i32
    %c0_i32_1 = arith.constant 0 : i32
    return %c0_i32, %c0_i32_0 : i32, i32
  }
  func.func @transform_6(%arg0: i32) -> (i32, i32, i32) {
    %c0_i32 = arith.constant 0 : i32
    %c0_i32_0 = arith.constant 0 : i32
    %c0_i32_1 = arith.constant 0 : i32
    %c0_i32_2 = arith.constant 0 : i32
    return %c0_i32, %c0_i32_0, %c0_i32_1 : i32, i32, i32
  }
  func.func @transform_7(%arg0: i32) -> (i32, i32) {
    %c0_i32 = arith.constant 0 : i32
    %c0_i32_0 = arith.constant 0 : i32
    return %arg0, %c0_i32 : i32, i32
  }
}

</mosaic_0001>

<bundles_post_ra>
// kernel: tpu_custom_call.1
= control target key start
LH: loop header
LB: loop body
LE: loop exit
PB: predicated region body
PF: predicated region fallthrough
CT: control target
= control target key end

     0   :  { %vm292_vm0 = vcmask 261120   ;;  %vm611_vm1 = vcmask 1042432   ;;  %vm56_vm2 = vsmask.f32 3328  ;;  %vm57_vm3 = vsmask.f32 7440  ;;  %s3192_s0 = inlined_call_operand.vmem [shape: bf16[8,18,32], index: 0, kind: input, shape index: {}]   ;;  %s3193_s1 = inlined_call_operand.vmem [shape: f32[8,16], index: 1, kind: input, shape index: {}]   ;;  %s3194_s2 = inlined_call_operand.vmem [shape: bf16[3,32,128], index: 2, kind: input, shape index: {}]   ;;  %s3195_s3 = inlined_call_operand.vmem [shape: f32[1,128], index: 3, kind: input, shape index: {}]   ;;  %s3196_s4 = inlined_call_operand.vmem [shape: bf16[128,16], index: 4, kind: input, shape index: {}]   ;;  %s3197_s5 = inlined_call_operand.vmem [shape: f32[1,16], index: 5, kind: input, shape index: {}]   ;;  %s3198_s6 = inlined_call_operand.vmem [shape: f32[1,1,16], index: 6, kind: input, shape index: {}]   ;;  %s3199_s7 = inlined_call_operand.hbm [shape: f32[8,128], index: 7, kind: output, shape index: {}]  }
   0x1   :  { %v2163_v0 = vld [vmem:[%s3194_s2] sm:$0xff]   ;;  %v2164_v1 = vld [vmem:[%s3194_s2 + $0x8] sm:$0xff]   ;;  %v2338_v8 = vld [vmem:[%s3192_s0 + $0x10] sm:$0xf]  ;;  %vm612_vm5 = vcmask 1046532  }
   0x2   :  { %2055 = vmatprep.subr.bf16.mxu0 %v2163_v0  ;;  %v28_v2 = vld [vmem:[%s3192_s0] sm:$0xf]  ;;  %v2329_v3 = vld [vmem:[%s3192_s0 + $0x4] sm:$0xf]  ;;  %v30_v7 = vld [vmem:[%s3192_s0 + $0xc] sm:$0xf] }
   0x3   :  { %2056 = vmatpush3.bf16.msra.mxu0 %v2163_v0  ;;  %v60_v4 = vshrl.u32 %v28_v2, 16  ;;  %v63_v5 = vshll.u32 %v28_v2, 16  ;;  %v1930_v6 = vcombine.low %v28_v2, %v2329_v3  ;;  %v616_v9 = vrot.slane %v2329_v3, 5  ;;  %v2167_v12 = vld [vmem:[%s3194_s2 + $0x20] sm:$0xff]   ;;  %v32_v18 = vld [vmem:[%s3192_s0 + $0x18] sm:$0xf]  ;;  %vm2481_vm4 = vmor %vm56_vm2, %vm57_vm3 }
   0x4   :  { %2057 = vmatprep.subr.bf16.mxu0 %v2164_v1  ;;  %v84_v10 = vshrl.u32 %v30_v7, 16  ;;  %v87_v11 = vshll.u32 %v30_v7, 16  ;;  %v623_v13 = vrot.slane %v2338_v8, 5  ;;  %v73_v16 = vshrl.u32 %v2329_v3, 16  ;;  %v2173_v19 = vld [vmem:[%s3194_s2 + $0x10] sm:$0xff]   ;;  %v2176_v24 = vld [vmem:[%s3194_s2 + $0x18] sm:$0xff]   ;;  %vm2504_vm6 = vmor %vm611_vm1, %vm612_vm5 }
   0x5   :  { %2059 = vmatprep.mubr.msk.bf16.mxu0 %vm292_vm0, %v1930_v6  ;;  %v62_v14 = vrot.slane %v60_v4, 4  ;;  %v65_v15 = vrot.slane %v63_v5, 5  ;;  %v1931_v17 = vcombine.low %v30_v7, %v2338_v8  ;;  %v97_v20 = vshrl.u32 %v2338_v8, 16  ;;  %v2358_v21 = vld [vmem:[%s3192_s0 + $0x1c] sm:$0xf]  ;;  %v2172_v30 = vld [vmem:[%s3194_s2 + $0x28] sm:$0xff]   ;;  %2035 = vmatprep.subr.bf16.mxu1 %v2173_v19 }
   0x6   :  { %v108_v22 = vshrl.u32 %v32_v18, 16  ;;  %v111_v23 = vshll.u32 %v32_v18, 16  ;;  %v2365_v25 = vrot.slane %v616_v9, 4  ;;  %v2367_v26 = vrot.slane %v84_v10, 4  ;;  %v34_v29 = vld [vmem:[%s3192_s0 + $0x24] sm:$0xf]  ;;  %2036 = vmatpush3.bf16.msra.mxu1 %v2173_v19 }
   0x7   :  { %2058 = vmatpush3.bf16.msra.mxu0 %v2164_v1  ;;  %v2369_v27 = vrot.slane %v87_v11, 5  ;;  %v1932_v28 = vcombine.low %v32_v18, %v2358_v21  ;;  %v2380_v31 = vrot.slane %v623_v13, 4  ;;  %v121_v32 = vshrl.u32 %v2358_v21, 16  ;;  %v36_v35 = vld [vmem:[%s3192_s0 + $0x30] sm:$0xf]  ;;  %2037 = vmatprep.subr.bf16.mxu1 %v2176_v24  ;;  %v2396_v41 = vld [vmem:[%s3196_s4] sm:$0xff]  }
   0x8   :  { %2075 = vmatprep.subr.bf16.mxu0 %v2167_v12  ;;  %v132_v33 = vshrl.u32 %v34_v29, 16  ;;  %v135_v34 = vshll.u32 %v34_v29, 16  ;;  %v2390_v36 = vld [vmem:[%s3192_s0 + $0x28] sm:$0xf]  ;;  %v156_v37 = vshrl.u32 %v36_v35, 16  ;;  %v159_v38 = vshll.u32 %v36_v35, 16 }
   0x9   :  { %v66_v39 = vor.u32 %v65_v15, %v62_v14  ;;  %v69_v40 = vshll.u32 %v2329_v3, 16  ;;  %v2398_v42 = vrot.slane %v108_v22, 4  ;;  %v2400_v43 = vrot.slane %v111_v23, 5  ;;  %v2409_v46 = vld [vmem:[%s3192_s0 + $0x34] sm:$0xf] }
   0xa   :  { %2060 = vmatmul.mubr.msk.bf16.vlgmr.msra.gmra.mrb[0].mxu0 %vm292_vm0, %v1931_v17  ;;  %v2403_v44 = vrot.slane %v132_v33, 4  ;;  %v145_v45 = vshrl.u32 %v2390_v36, 16  ;;  %v2411_v47 = vrot.slane %v135_v34, 5  ;;  %v169_v48 = vshrl.u32 %v2409_v46, 16  ;;  %v2417_v49 = vld [vmem:[%s3192_s0 + $0x3c] sm:$0xf]  ;;  %2038 = vmatpush3.bf16.msra.mxu1 %v2176_v24 }
   0xb   :  { %2076 = vmatpush3.bf16.msra.mxu0 %v2167_v12  ;;  %2063 = vmatprep.mubr.msk.bf16.mxu0 %vm292_vm0, %v1932_v28  ;;  %v2422_v50 = vld [vmem:[%s3192_s0 + $0x40] sm:$0xf]  ;;  %v180_v51 = vshrl.u32 %v2417_v49, 16  ;;  %v183_v52 = vshll.u32 %v2417_v49, 16  ;;  %v1933_v53 = vcombine.low %v34_v29, %v2390_v36  ;;  %v2427_v54 = vrot.slane %v156_v37, 4 }
   0xc   :  { %2077 = vmatprep.subr.bf16.mxu0 %v2172_v30  ;;  %v2429_v55 = vrot.slane %v159_v38, 5  ;;  %2095 = vmatprep.subr.bf16.mxu1 %v2396_v41  ;;  %v1934_v56 = vcombine.low %v36_v35, %v2409_v46  ;;  %v193_v57 = vshrl.u32 %v2422_v50, 16  ;;  %v40_v58 = vld [vmem:[%s3192_s0 + $0x48] sm:$0xf]  ;;  %v2440_v59 = vld [vmem:[%s3192_s0 + $0x4c] sm:$0xf]  ;;  %v90_v61 = vor.u32 %v2369_v27, %v2367_v26 }
   0xd   :  { %v67_v60 = vrot.slane %v66_v39, 4  ;;  %v1935_v62 = vcombine.low %v2417_v49, %v2422_v50  ;;  %v204_v63 = vshrl.u32 %v40_v58, 16  ;;  %v207_v0 = vshll.u32 %v40_v58, 16  ;;  %v2449_v1 = vld [vmem:[%s3192_s0 + $0x54] sm:$0xf] }
   0xe   :  { %v2454_v2 = vld [vmem:[%s3192_s0 + $0x58] sm:$0xf]  ;;  %v114_v4 = vor.u32 %v2400_v43, %v2398_v42  ;;  %v2458_v5 = vrot.slane %v180_v51, 4  ;;  %v2460_v6 = vrot.slane %v183_v52, 5  ;;  %v217_v7 = vshrl.u32 %v2440_v59, 16 }
   0xf   :  { %2078 = vmatpush3.bf16.msra.mxu0 %v2172_v30  ;;  %v138_v10 = vor.u32 %v2411_v47, %v2403_v44  ;;  %v1936_v11 = vcombine.low %v40_v58, %v2440_v59  ;;  %v228_v12 = vshrl.u32 %v2449_v1, 16  ;;  %v231_v14 = vshll.u32 %v2449_v1, 16  ;;  %v48_v15 = vld [vmem:[%s3192_s0 + $0x8] sm:$0x1]  ;;  %v49_v28 = vld [vmem:[%s3192_s0 + $0x14] sm:$0x1] }
  0x10   :  { %v162_v17 = vor.u32 %v2429_v55, %v2427_v54  ;;  %v2475_v18 = vrot.slane %v204_v63, 4  ;;  %v1937_v19 = vcombine.low %v2449_v1, %v2454_v2  ;;  %v2479_v22 = vrot.slane %v207_v0, 5  ;;  %v587_v35 = vld [vmem:[%s3192_s0] sm:$0xe] }
  0x11   :  { %v71_v24 = vrot.slane %v69_v40, 5  ;;  %v75_v26 = vrot.slane %v73_v16, 4  ;;  %v79_v27 = vshll.u32 %v48_v15, 16  ;;  %v619_v29 = vrot.slane %v48_v15, 5  ;;  %v588_v16 = vld [vmem:[%s3192_s0 + $0xc] sm:$0xe] }
  0x12   :  { %2064 = vmatmul.mubr.msk.bf16.gmra.mrb[4].mxu0 %vm292_vm0, %v1933_v53  ;;  %v93_v30 = vshll.u32 %v2338_v8, 16  ;;  %v99_v33 = vrot.slane %v97_v20, 4  ;;  %v103_v34 = vshll.u32 %v49_v28, 16  ;;  %v91_v39 = vrot.slane %v90_v61, 4  ;;  %v50_v61 = vld [vmem:[%s3192_s0 + $0x20] sm:$0x1] }
  0x13   :  { %2067 = vmatprep.mubr.msk.bf16.mxu0 %vm292_vm0, %v1934_v56  ;;  %v76_v37 = vor.u32 %v75_v26, %v71_v24  ;;  %v81_v38 = vrot.slane %v79_v27, 5  ;;  %v186_v40 = vor.u32 %v2460_v6, %v2458_v5  ;;  %v72_v42 = vsel %vm2481_vm4, %v67_v60, %v71_v24  ;;  %v590_v8 = vld [vmem:[%s3192_s0 + $0x24] sm:$0xe] }
  0x14   :  { %v95_v43 = vrot.slane %v93_v30, 5  ;;  %v1948_v20 = vrot.slane %v587_v35, 9  ;;  %v626_v47 = vrot.slane %v49_v28, 5  ;;  %v1949_v51 = vrot.slane %v588_v16, 9 }
  0x15   :  { %v77_v44 = vrot.slane %v76_v37, 4  ;;  %v117_v52 = vshll.u32 %v2358_v21, 16  ;;  %v105_v56 = vrot.slane %v103_v34, 5  ;;  %v620_v60 = vsel %vm2504_vm6, %v2365_v25, %v619_v29 }
  0x16   :  { %v100_v53 = vor.u32 %v99_v33, %v95_v43  ;;  %v617_v58 = vsel %vm2504_vm6, %v1948_v20, %v616_v9  ;;  %v96_v0 = vsel %vm2481_vm4, %v91_v39, %v95_v43  ;;  %v115_v15 = vrot.slane %v114_v4, 4  ;;  %v2527_v9 = vld [vmem:[%s3192_s0 + $0x2c] sm:$0x1]  ;;  %v589_v4 = vld [vmem:[%s3192_s0 + $0x18] sm:$0xe] }
  0x17   :  { %v82_v63 = vsel %vm2481_vm4, %v77_v44, %v81_v38  ;;  %v1960_v3 = vcombine.low %v617_v58, %v620_v60  ;;  %v119_v26 = vrot.slane %v117_v52, 5  ;;  %v123_v27 = vrot.slane %v121_v32, 4 }
  0x18   :  { %v1912_v25 = vcombine.low %v72_v42, %v82_v63  ;;  %v101_v24 = vrot.slane %v100_v53, 4  ;;  %v127_v28 = vshll.u32 %v50_v61, 16  ;;  %v139_v29 = vrot.slane %v138_v10, 4  ;;  %v2585_v63 = vld [vmem:[%s3192_s0 + $0x44] sm:$0x1] }
  0x19   :  { %v2554_v32 = vsel %vm2504_vm6, %v2380_v31, %v626_v47  ;;  %v147_v10 = vrot.slane %v145_v45, 4  ;;  %v151_v33 = vshll.u32 %v2527_v9, 16  ;;  %v124_v35 = vor.u32 %v123_v27, %v119_v26  ;;  %v2568_v47 = vld [vmem:[%s3192_s0 + $0x38] sm:$0x1] }
  0x1a   :  { %2068 = vmatmul.mubr.msk.bf16.gmra.mrb[8].mxu0 %vm292_vm0, %v1935_v62  ;;  %v2534_v62 = vsel %vm2504_vm6, %v1949_v51, %v623_v13  ;;  %v2178_v13 = vld [vmem:[%s3196_s4 + $0x8] sm:$0xff]   ;;  %2039 = vmatprep.mubr.msk.bf16.mxu1 %vm292_vm0, %v1912_v25  ;;  %v106_v30 = vsel %vm2481_vm4, %v101_v24, %v105_v56  ;;  %v129_v37 = vrot.slane %v127_v28, 5  ;;  %v120_v39 = vsel %vm2481_vm4, %v115_v15, %v119_v26 }
  0x1b   :  { %2071 = vmatprep.mubr.msk.bf16.mxu0 %vm292_vm0, %v1936_v11  ;;  %v141_v11 = vshll.u32 %v2390_v36, 16  ;;  %v1913_v34 = vcombine.low %v96_v0, %v106_v30  ;;  %v1950_v16 = vrot.slane %v589_v4, 9  ;;  %v630_v42 = vrot.slane %v2358_v21, 5 }
  0x1c   :  { %v633_v43 = vrot.slane %v50_v61, 5  ;;  %v125_v31 = vrot.slane %v124_v35, 4  ;;  %v153_v44 = vrot.slane %v151_v33, 5  ;;  %v1951_v53 = vrot.slane %v590_v8, 9 }
  0x1d   :  { %v143_v38 = vrot.slane %v141_v11, 5  ;;  %2040 = vmatmul.mubr.msk.bf16.vlgmr.msra.gmra.mrb[0].mxu1 %vm292_vm0, %v1913_v34  ;;  %v631_v51 = vsel %vm2504_vm6, %v1950_v16, %v630_v42  ;;  %v632_v52 = vrot.slane %v630_v42, 4  ;;  %v637_v21 = vrot.slane %v2390_v36, 5  ;;  %v2179_v36 = vld [vmem:[%s3196_s4 + $0x10] sm:$0xff]  }
  0x1e   :  { %2096 = vmatpush3.bf16.msra.mxu1 %v2396_v41  ;;  %v130_v56 = vsel %vm2481_vm4, %v125_v31, %v129_v37  ;;  %v640_v60 = vrot.slane %v2527_v9, 5  ;;  %v165_v61 = vshll.u32 %v2409_v46, 16  ;;  %v163_v15 = vrot.slane %v162_v17, 4  ;;  %v591_v9 = vld [vmem:[%s3192_s0 + $0x30] sm:$0xe] }
  0x1f   :  { %v144_v20 = vsel %vm2481_vm4, %v139_v29, %v143_v38  ;;  %v148_v45 = vor.u32 %v147_v10, %v143_v38  ;;  %2097 = vmatprep.subr.bf16.mxu1 %v2178_v13  ;;  %v1914_v41 = vcombine.low %v120_v39, %v130_v56  ;;  %v639_v0 = vrot.slane %v637_v21, 4 }
  0x20   :  { %v1961_v25 = vcombine.low %v2534_v62, %v2554_v32  ;;  %v171_v26 = vrot.slane %v169_v48, 4  ;;  %v2608_v54 = vsel %vm2504_vm6, %v1951_v53, %v637_v21  ;;  %v175_v55 = vshll.u32 %v2568_v47, 16 }
  0x21   :  { %v149_v58 = vrot.slane %v148_v45, 4  ;;  %2043 = vmatprep.mubr.msk.bf16.mxu1 %vm292_vm0, %v1914_v41  ;;  %v2613_v17 = vsel %vm2504_vm6, %v639_v0, %v640_v60  ;;  %v187_v48 = vrot.slane %v186_v40, 4  ;;  %v189_v28 = vshll.u32 %v2422_v50, 16 }
  0x22   :  { %2072 = vmatmul.mubr.msk.bf16.gmra.mrb[12].mxu0 %vm292_vm0, %v1937_v19  ;;  %v634_v19 = vsel %vm2504_vm6, %v632_v52, %v633_v43  ;;  %2098 = vmatpush3.bf16.msra.mxu1 %v2178_v13 }
  0x23   :  { %2079 = vmatprep.mubr.msk.bf16.mxu0 %vm292_vm0, %v1960_v3  ;;  %v154_v24 = vsel %vm2481_vm4, %v149_v58, %v153_v44  ;;  %v167_v3 = vrot.slane %v165_v61, 5  ;;  %v1962_v27 = vcombine.low %v631_v51, %v634_v19  ;;  %2099 = vmatprep.subr.bf16.mxu1 %v2179_v36 }
  0x24   :  { %v1915_v4 = vcombine.low %v144_v20, %v154_v24 }
  0x25   :  { %v172_v62 = vor.u32 %v171_v26, %v167_v3 }
  0x26   :  { %12 = vsyncpa [#allocation3], 0  ;;  %v168_v29 = vsel %vm2481_vm4, %v163_v15, %v167_v3  ;;  %v177_v11 = vrot.slane %v175_v55, 5  ;;  %v195_v8 = vrot.slane %v193_v57, 4  ;;  %v199_v13 = vshll.u32 %v2585_v63, 16  ;;  %v2180_v30 = vld [vmem:[%s3196_s4 + $0x18] sm:$0xff]   ;;  %2044 = vmatmul.mubr.msk.bf16.gmra.mrb[4].mxu1 %vm292_vm0, %v1915_v4 }
  0x27   :  { %v173_v5 = vrot.slane %v172_v62, 4  ;;  %v191_v6 = vrot.slane %v189_v28, 5  ;;  %v1952_v40 = vrot.slane %v591_v9, 9  ;;  %v644_v32 = vrot.slane %v2409_v46, 5  ;;  %v592_v35 = vld [vmem:[%s3192_s0 + $0x3c] sm:$0xe]  ;;  %2100 = vmatpush3.bf16.msra.mxu1 %v2179_v36 }
  0x28   :  { %v230_v10 = vrot.slane %v228_v12, 4  ;;  %v233_v33 = vrot.slane %v231_v14, 5  ;;  %v241_v57 = vshrl.u32 %v2454_v2, 16  ;;  %v647_v34 = vrot.slane %v2568_v47, 5  ;;  %v54_v1 = vld [vmem:[%s3192_s0 + $0x50] sm:$0x1]  ;;  %2101 = vmatprep.subr.bf16.mxu1 %v2180_v30 }
  0x29   :  { %v178_v46 = vsel %vm2481_vm4, %v173_v5, %v177_v11  ;;  %v196_v37 = vor.u32 %v195_v8, %v191_v6  ;;  %v201_v38 = vrot.slane %v199_v13, 5  ;;  %v651_v12 = vrot.slane %v2422_v50, 5  ;;  %v2181_v14 = vld [vmem:[%s3196_s4 + $0x20] sm:$0xff]   ;;  %v55_v44 = vld [vmem:[%s3192_s0 + $0x5c] sm:$0x1]  ;;  %v2182_v23 = vld [vmem:[%s3196_s4 + $0x28] sm:$0xff]  }
  0x2a   :  { %2080 = vmatmul.mubr.msk.bf16.vlgmr.msra.gmra.mrb[0].mxu0 %vm292_vm0, %v1961_v25  ;;  %v1963_v39 = vcombine.low %v2608_v54, %v2613_v17  ;;  %v1916_v16 = vcombine.low %v168_v29, %v178_v46  ;;  %v192_v42 = vsel %vm2481_vm4, %v187_v48, %v191_v6  ;;  %v646_v43 = vrot.slane %v644_v32, 4  ;;  %v594_v29 = vld [vmem:[%s3192_s0 + $0x54] sm:$0xe]  ;;  %v2184_v49 = vld [vmem:[%s3196_s4 + $0x38] sm:$0xff]  }
  0x2b   :  { %2083 = vmatprep.mubr.msk.bf16.mxu0 %vm292_vm0, %v1962_v27  ;;  %v197_v50 = vrot.slane %v196_v37, 4  ;;  %v645_v31 = vsel %vm2504_vm6, %v1952_v40, %v644_v32  ;;  %v210_v20 = vor.u32 %v2479_v22, %v2475_v18  ;;  %v213_v45 = vshll.u32 %v2440_v59, 16  ;;  %v593_v18 = vld [vmem:[%s3192_s0 + $0x48] sm:$0xe]  ;;  %2102 = vmatpush3.bf16.msra.mxu1 %v2180_v30  ;;  %v2183_v37 = vld [vmem:[%s3196_s4 + $0x30] sm:$0xff]  }
  0x2c   :  { %2047 = vmatprep.mubr.msk.bf16.mxu1 %vm292_vm0, %v1916_v16  ;;  %v648_v47 = vsel %vm2504_vm6, %v646_v43, %v647_v34  ;;  %v1953_v51 = vrot.slane %v592_v35, 9  ;;  %v219_v52 = vrot.slane %v217_v7, 4  ;;  %v223_v53 = vshll.u32 %v54_v1, 16  ;;  %2103 = vmatprep.subr.bf16.mxu1 %v2181_v14 }
  0x2d   :  { %v202_v22 = vsel %vm2481_vm4, %v197_v50, %v201_v38  ;;  %v653_v21 = vrot.slane %v651_v12, 4  ;;  %v654_v56 = vrot.slane %v2585_v63, 5  ;;  %v234_v58 = vor.u32 %v233_v33, %v230_v10 }
  0x2e   :  { %v1917_v60 = vcombine.low %v192_v42, %v202_v22  ;;  %v1964_v61 = vcombine.low %v645_v31, %v648_v47  ;;  %v211_v36 = vrot.slane %v210_v20, 4  ;;  %v215_v41 = vrot.slane %v213_v45, 5 }
  0x2f   :  { %v237_v7 = vshll.u32 %v2454_v2, 16  ;;  %v243_v19 = vrot.slane %v241_v57, 4  ;;  %v247_v0 = vshll.u32 %v55_v44, 16  ;;  %v1954_v15 = vrot.slane %v593_v18, 9  ;;  %2104 = vmatpush3.bf16.msra.mxu1 %v2181_v14 }
  0x30   :  { %2048 = vmatmul.mubr.msk.bf16.gmra.mrb[8].mxu1 %vm292_vm0, %v1917_v60  ;;  %v220_v9 = vor.u32 %v219_v52, %v215_v41  ;;  %v225_v25 = vrot.slane %v223_v53, 5  ;;  %v658_v24 = vrot.slane %v2440_v59, 5  ;;  %v661_v3 = vrot.slane %v54_v1, 5  ;;  %2105 = vmatprep.subr.bf16.mxu1 %v2182_v23  ;;  %v2721_v1 = vld [vmem:[%s3193_s1] sm:$0xff] }
  0x31   :  { %v652_v63 = vsel %vm2504_vm6, %v1953_v51, %v651_v12  ;;  %v655_v26 = vsel %vm2504_vm6, %v653_v21, %v654_v56  ;;  %v235_v4 = vrot.slane %v234_v58, 4  ;;  %v239_v27 = vrot.slane %v237_v7, 5  ;;  %v2761_v7 = vld [vmem:[%s3195_s3] ss:$0 sm:$0xff] }
  0x32   :  { %2084 = vmatmul.mubr.msk.bf16.gmra.mrb[4].mxu0 %vm292_vm0, %v1963_v39  ;;  %v216_v54 = vsel %vm2481_vm4, %v211_v36, %v215_v41  ;;  %v221_v55 = vrot.slane %v220_v9, 4  ;;  %v660_v17 = vrot.slane %v658_v24, 4  ;;  %v665_v59 = vrot.slane %v2454_v2, 5 }
  0x33   :  { %2087 = vmatprep.mubr.msk.bf16.mxu0 %vm292_vm0, %v1964_v61  ;;  %v244_v62 = vor.u32 %v243_v19, %v239_v27  ;;  %v249_v48 = vrot.slane %v247_v0, 5  ;;  %v659_v28 = vsel %vm2504_vm6, %v1954_v15, %v658_v24  ;;  %v1965_v13 = vcombine.low %v652_v63, %v655_v26  ;;  %2106 = vmatpush3.bf16.msra.mxu1 %v2182_v23 }
  0x34   :  { %v226_v11 = vsel %vm2481_vm4, %v221_v55, %v225_v25  ;;  %v662_v8 = vsel %vm2504_vm6, %v660_v17, %v661_v3  ;;  %v240_v2 = vsel %vm2481_vm4, %v235_v4, %v239_v27  ;;  %v1955_v40 = vrot.slane %v594_v29, 9  ;;  %2107 = vmatprep.subr.bf16.mxu1 %v2183_v37 }
  0x35   :  { %v1918_v30 = vcombine.low %v216_v54, %v226_v11  ;;  %v245_v5 = vrot.slane %v244_v62, 4  ;;  %v1966_v6 = vcombine.low %v659_v28, %v662_v8  ;;  %v667_v32 = vrot.slane %v665_v59, 4 }
  0x36   :  { %v668_v10 = vrot.slane %v55_v44, 5  ;;  %v666_v34 = vsel %vm2504_vm6, %v1955_v40, %v665_v59  ;;  %v1153_v38 = vlaneseq  ;;  %vm1102_vm7 = vcmask 130048  }
  0x37   :  { %2051 = vmatprep.mubr.msk.bf16.mxu1 %vm292_vm0, %v1918_v30  ;;  %v250_v33 = vsel %vm2481_vm4, %v245_v5, %v249_v48  ;;  %2108 = vmatpush3.bf16.msra.mxu1 %v2183_v37  ;;  %vm1348_vm8 = vcmask 130112   ;;  %vm1413_vm9 = vcmask 1041409   ;;  %vm1415_vm10 = vcmask 1042434  }
  0x38   :  { %v1919_v57 = vcombine.low %v240_v2, %v250_v33  ;;  %v669_v35 = vsel %vm2504_vm6, %v667_v32, %v668_v10  ;;  %2109 = vmatprep.subr.bf16.mxu1 %v2184_v49  ;;  %v2716_v12 = vshrl.u32 %v1153_v38, 7  ;;  %vm1417_vm11 = vcmask 1043459  }
  0x39   :  { %v1967_v46 = vcombine.low %v666_v34, %v669_v35  ;;  %vm1419_vm12 = vcmask 1044484   ;;  %vm1421_vm13 = vcmask 1045509   ;;  %vm1423_vm14 = vcmask 1046534  }
  0x3a   :  { %2088 = vmatmul.mubr.msk.bf16.gmra.mrb[8].mxu0 %vm292_vm0, %v1965_v13  ;;  %2052 = vmatmul.mubr.msk.bf16.gmra.mrb[12].mxu1 %vm292_vm0, %v1919_v57  ;;  %v2724_v14 = vsub.s32 0, %v2716_v12  ;;  %v2727_v39 = vsub.s32 1, %v2716_v12  ;;  %v2732_v42 = vsub.s32 2, %v2716_v12  ;;  %v2739_v31 = vsub.s32 3, %v2716_v12 }
  0x3b   :  { %2091 = vmatprep.mubr.msk.bf16.mxu0 %vm292_vm0, %v1966_v6  ;;  %2110 = vmatpush3.bf16.msra.mxu1 %v2184_v49  ;;  %v2744_v45 = vsub.s32 4, %v2716_v12  ;;  %v2749_v47 = vsub.s32 5, %v2716_v12  ;;  %v2754_v52 = vsub.s32 6, %v2716_v12  ;;  %vm1425_vm15 = vcmask 1047559  }
  0x3c   :  { %v1156_v16 = vrot.slane %v2721_v1, %v2724_v14  ;;  %v1167_v43 = vrot.slane %v2721_v1, %v2727_v39  ;;  %v1178_v50 = vrot.slane %v2721_v1, %v2732_v42  ;;  %v1189_v20 = vrot.slane %v2721_v1, %v2739_v31 }
  0x3d   :  { %v1200_v44 = vrot.slane %v2721_v1, %v2744_v45  ;;  %v1211_v51 = vrot.slane %v2721_v1, %v2749_v47  ;;  %v1222_v53 = vrot.slane %v2721_v1, %v2754_v52 }
  0x3e   :  { %1162 = vbcast.lane.b32.xlu1 %v1156_v16, 264  ;;  %1158 = vbcast.lane.b32.xlu0 %v1156_v16, 256 }
  0x42   :  { %2092 = vmatmul.mubr.msk.bf16.gmra.mrb[12].mxu0 %vm292_vm0, %v1967_v46  ;;  %1169 = vbcast.lane.b32.xlu1 %v1167_v43, 256 }
  0x43   :  { %1180 = vbcast.lane.b32.xlu0 %v1178_v50, 256 }
  0x46   :  { %1173 = vbcast.lane.b32.xlu1 %v1167_v43, 264 }
  0x47   :  { %1191 = vbcast.lane.b32.xlu0 %v1189_v20, 256 }
  0x4a   :  { %1184 = vbcast.lane.b32.xlu1 %v1178_v50, 264 }
  0x4b   :  { %1202 = vbcast.lane.b32.xlu0 %v1200_v44, 256 }
  0x4e   :  { %1195 = vbcast.lane.b32.xlu1 %v1189_v20, 264 }
  0x4f   :  { %1213 = vbcast.lane.b32.xlu0 %v1211_v51, 256 }
  0x52   :  { %1206 = vbcast.lane.b32.xlu1 %v1200_v44, 264 }
  0x53   :  { %1224 = vbcast.lane.b32.xlu0 %v1222_v53, 256 }
  0x56   :  { %1217 = vbcast.lane.b32.xlu1 %v1211_v51, 264 }
  0x5a   :  { %1228 = vbcast.lane.b32.xlu1 %v1222_v53, 264 }
  0xf0   :  { %v2041_v18 = vpop.f32.mrb[0].mxu1 }
  0xf1   :  { %v351_v22 = vpop.f32.mrb[1].mxu1 }
  0xf2   :  { %v2042_v21 = vpop.f32.mrb[2].mxu1 }
  0xf3   :  { %v354_v56 = vpop.f32.mrb[3].mxu1 }
  0xf9   :  { %v2045_v58 = vpop.f32.mrb[4].mxu1 }
  0xfa   :  { %v367_v60 = vpop.f32.mrb[5].mxu1 }
  0xfb   :  { %v2046_v36 = vpop.f32.mrb[6].mxu1 }
  0xfc   :  { %v370_v0 = vpop.f32.mrb[7].mxu1 }
  0xfd   :  { %v2081_v61 = vpop.f32.mrb[0].mxu0 }
  0xfe   :  { %v2127_v41 = vadd.f32 %v2081_v61, %v2041_v18  ;;  %v769_v19 = vpop.f32.mrb[1].mxu0 }
  0xff   :  { %v2128_v15 = vadd.f32 %v769_v19, %v351_v22  ;;  %v2082_v9 = vpop.f32.mrb[2].mxu0 }
 0x100   :  { %v2129_v25 = vadd.f32 %v2082_v9, %v2042_v21  ;;  %v772_v24 = vpop.f32.mrb[3].mxu0  ;;  %v2767_v26 = vadd.f32 %v2127_v41, %v2761_v7 }
 0x101   :  { %v2764_v3 = vadd.f32 %v2128_v15, %v2761_v7  ;;  %v2130_v63 = vadd.f32 %v772_v24, %v354_v56 }
 0x102   :  { %v2770_v4 = vadd.f32 %v2129_v25, %v2761_v7  ;;  %v3212_v28 = vmax.f32 %v2767_v26, 0.0 }
 0x103   :  { %v2773_v27 = vadd.f32 %v2130_v63, %v2761_v7  ;;  %v2049_v55 = vpop.f32.mrb[8].mxu1  ;;  %v3208_v17 = vmax.f32 %v2764_v3, 0.0 }
 0x104   :  { %v3215_v54 = vmax.f32 %v2770_v4, 0.0  ;;  %v383_v48 = vpop.f32.mrb[9].mxu1 }
 0x105   :  { %v3213_v59 = vmax.f32 %v2773_v27, 0.0  ;;  %v2085_v62 = vpop.f32.mrb[4].mxu0  ;;  %v2050_v8 = vpop.f32.mrb[10].mxu1 }
 0x106   :  { %v2131_v29 = vadd.f32 %v2085_v62, %v2045_v58  ;;  %v785_v11 = vpop.f32.mrb[5].mxu0  ;;  %v386_v5 = vpop.f32.mrb[11].mxu1  ;;  %v888_v6 = vpack.c.bf16 %v3215_v54, %v3212_v28 }
 0x107   :  { %v2132_v13 = vadd.f32 %v785_v11, %v367_v60  ;;  %v2086_v30 = vpop.f32.mrb[6].mxu0  ;;  %v887_v2 = vpack.c.bf16 %v3213_v59, %v3208_v17 }
 0x108   :  { %v2133_v40 = vadd.f32 %v2086_v30, %v2046_v36  ;;  %v788_v32 = vpop.f32.mrb[7].mxu0  ;;  %v2791_v57 = vadd.f32 %v2131_v29, %v2761_v7 }
 0x109   :  { %v2788_v10 = vadd.f32 %v2132_v13, %v2761_v7  ;;  %v2134_v33 = vadd.f32 %v788_v32, %v370_v0  ;;  %2111 = vmatprep.mubr.bf16.mxu1 %v887_v2 }
 0x10a   :  { %v2794_v34 = vadd.f32 %v2133_v40, %v2761_v7  ;;  %2112 = vmatmul.mubr.bf16.vlgmr.msra.gmra.mrb[16].mxu1 %v888_v6  ;;  %v3207_v16 = vmax.f32 %v2791_v57, 0.0 }
 0x10b   :  { %v2797_v35 = vadd.f32 %v2134_v33, %v2761_v7  ;;  %v3210_v23 = vmax.f32 %v2788_v10, 0.0 }
 0x10c   :  { %v3211_v46 = vmax.f32 %v2794_v34, 0.0 }
 0x10d   :  { %v3214_v37 = vmax.f32 %v2797_v35, 0.0  ;;  %v2089_v49 = vpop.f32.mrb[8].mxu0  ;;  %v2053_v20 = vpop.f32.mrb[12].mxu1 }
 0x10e   :  { %v2135_v43 = vadd.f32 %v2089_v49, %v2049_v55  ;;  %v801_v50 = vpop.f32.mrb[9].mxu0  ;;  %v399_v18 = vpop.f32.mrb[13].mxu1  ;;  %v890_v56 = vpack.c.bf16 %v3211_v46, %v3207_v16 }
 0x10f   :  { %v2136_v44 = vadd.f32 %v801_v50, %v383_v48  ;;  %v2090_v51 = vpop.f32.mrb[10].mxu0  ;;  %v889_v53 = vpack.c.bf16 %v3214_v37, %v3210_v23  ;;  %v2054_v58 = vpop.f32.mrb[14].mxu1 }
 0x110   :  { %v2137_v22 = vadd.f32 %v2090_v51, %v2050_v8  ;;  %v804_v21 = vpop.f32.mrb[11].mxu0  ;;  %v402_v36 = vpop.f32.mrb[15].mxu1  ;;  %v2815_v41 = vadd.f32 %v2135_v43, %v2761_v7 }
 0x111   :  { %v2812_v60 = vadd.f32 %v2136_v44, %v2761_v7  ;;  %v2138_v61 = vadd.f32 %v804_v21, %v386_v5  ;;  %2115 = vmatprep.mubr.bf16.mxu1 %v889_v53 }
 0x112   :  { %v2818_v19 = vadd.f32 %v2137_v22, %v2761_v7  ;;  %2116 = vmatmul.mubr.bf16.gmra.mrb[20].mxu1 %v890_v56  ;;  %v3205_v63 = vmax.f32 %v2815_v41, 0.0 }
 0x113   :  { %v2821_v0 = vadd.f32 %v2138_v61, %v2761_v7  ;;  %v3206_v9 = vmax.f32 %v2812_v60, 0.0 }
 0x114   :  { %v3204_v15 = vmax.f32 %v2818_v19, 0.0 }
 0x115   :  { %v3209_v25 = vmax.f32 %v2821_v0, 0.0  ;;  %v2093_v24 = vpop.f32.mrb[12].mxu0 }
 0x116   :  { %v2139_v55 = vadd.f32 %v2093_v24, %v2053_v20  ;;  %v817_v62 = vpop.f32.mrb[13].mxu0  ;;  %v892_v30 = vpack.c.bf16 %v3204_v15, %v3205_v63  ;;  %v1338_v15 = vand.u32 127, %v1153_v38 }
 0x117   :  { %v2140_v48 = vadd.f32 %v817_v62, %v399_v18  ;;  %v2094_v29 = vpop.f32.mrb[14].mxu0  ;;  %v891_v11 = vpack.c.bf16 %v3209_v25, %v3206_v9 }
 0x118   :  { %v2141_v8 = vadd.f32 %v2094_v29, %v2054_v58  ;;  %v820_v13 = vpop.f32.mrb[15].mxu0  ;;  %v2839_v6 = vadd.f32 %v2139_v55, %v2761_v7  ;;  %v1343_v63 = vadd.s32 4294967288, %v1338_v15 }
 0x119   :  { %v2836_v2 = vadd.f32 %v2140_v48, %v2761_v7  ;;  %v2142_v5 = vadd.f32 %v820_v13, %v402_v36  ;;  %2119 = vmatprep.mubr.bf16.mxu1 %v891_v11 }
 0x11a   :  { %3222 = vst [vmem:[#allocation5_spill] sm:$0xff] %v2839_v6  ;;  %v2842_v40 = vadd.f32 %v2141_v8, %v2761_v7  ;;  %2120 = vmatmul.mubr.bf16.gmra.mrb[24].mxu1 %v892_v30  ;;  %v3200_v50 = vmax.f32 %v2839_v6, 0.0  ;;  %v2874_v8 = vld [vmem:[%s3198_s6] ss:$0 sm:$0xff]  ;;  %s2276_s6 = smov [#allocation2]  }
 0x11b   :  { %v2845_v32 = vadd.f32 %v2142_v5, %v2761_v7  ;;  %v3203_v49 = vmax.f32 %v2836_v2, 0.0  ;;  %v2862_v7 = vld [vmem:[%s3197_s5] ss:$0 sm:$0xff]  ;;  %s1900_s24 = sshll.u32 %s2276_s6, 4  ;;  %s1901_s24 = int_to_ptr.vmem [resolvable:$true] %s1900_s24 }
 0x11c   :  { %3223 = vst [vmem:[#allocation6_spill] sm:$0xff] %v2842_v40  ;;  %v3201_v33 = vmax.f32 %v2842_v40, 0.0  ;;  %s2251_s25 = scalar_lea.vmem %s1901_s24, 128  ;;  %p2256_p1 = scmp.lt.s32.totalorder %s1901_s24, %s1901_s24 }
 0x11d   :  { %v3202_v43 = vmax.f32 %v2845_v32, 0.0  ;;  %p2252_p0 = scmp.ne.s32.totalorder %s1901_s24, %s2251_s25  ;;  %p2257_p2 = scmp.lt.s32.totalorder %s2251_s25, %s2251_s25 }
 0x11e   :  { %v894_v44 = vpack.c.bf16 %v3201_v33, %v3200_v50 }
 0x11f   :  { %v893_v20 = vpack.c.bf16 %v3202_v43, %v3203_v49  ;;  %p2258_p3 = por %p2257_p2, %p2256_p1 }
 0x121   :  { %2123 = vmatprep.mubr.bf16.mxu1 %v893_v20  ;;  %p2259_p4 = pnand %p2258_p3, %p2252_p0 }
 0x122   :  { %2124 = vmatmul.mubr.bf16.gmra.mrb[28].mxu1 %v894_v44 }
 0x1dd   :  { %v2113_v51 = vpop.f32.mrb[16].mxu1 }
 0x1de   :  { %v1009_v53 = vadd.f32 %v2113_v51, %v2862_v7  ;;  %v1000_v18 = vpop.f32.mrb[17].mxu1 }
 0x1df   :  { %v1001_v22 = vadd.f32 %v2862_v7, %v1000_v18  ;;  %v2114_v21 = vpop.f32.mrb[18].mxu1 }
 0x1e0   :  { %2185 = vtanh.f32 %v1009_v53  ;;  %v1012_v56 = vadd.f32 %v2114_v21, %v2862_v7  ;;  %v1003_v58 = vpop.f32.mrb[19].mxu1 }
 0x1e1   :  { %2187 = vtanh.f32 %v1001_v22  ;;  %v1004_v61 = vadd.f32 %v2862_v7, %v1003_v58 }
 0x1e2   :  { %2189 = vtanh.f32 %v1012_v56 }
 0x1e3   :  { %2191 = vtanh.f32 %v1004_v61 }
 0x1e5   :  { %v2117_v36 = vpop.f32.mrb[20].mxu1 }
 0x1e6   :  { %v1025_v24 = vadd.f32 %v2117_v36, %v2862_v7  ;;  %v1016_v55 = vpop.f32.mrb[21].mxu1 }
 0x1e7   :  { %v1017_v62 = vadd.f32 %v2862_v7, %v1016_v55  ;;  %v2118_v48 = vpop.f32.mrb[22].mxu1 }
 0x1e8   :  { %2193 = vtanh.f32 %v1025_v24  ;;  %v1028_v29 = vadd.f32 %v2118_v48, %v2862_v7  ;;  %v1019_v11 = vpop.f32.mrb[23].mxu1 }
 0x1e9   :  { %2195 = vtanh.f32 %v1017_v62  ;;  %v1020_v13 = vadd.f32 %v2862_v7, %v1019_v11 }
 0x1ea   :  { %v2186_v30 = vpop.eup %2185  ;;  %2197 = vtanh.f32 %v1028_v29 }
 0x1eb   :  { %v2188_v5 = vpop.eup %2187  ;;  %2199 = vtanh.f32 %v1020_v13  ;;  %v1088_v20 = vmul.f32 %v2186_v30, %v2874_v8 }
 0x1ec   :  { %v2190_v44 = vpop.eup %2189  ;;  %v1086_v51 = vmul.f32 %v2188_v5, %v2874_v8 }
 0x1ed   :  { %v2192_v53 = vpop.eup %2191  ;;  %v2121_v18 = vpop.f32.mrb[24].mxu1  ;;  %v1109_v22 = vsel %vm1102_vm7, %v1088_v20, 0.0  ;;  %v1089_v21 = vmul.f32 %v2190_v44, %v2874_v8 }
 0x1ee   :  { %v1041_v56 = vadd.f32 %v2121_v18, %v2862_v7  ;;  %1110 = vadd.xlane.f32.xlu1 %v1109_v22  ;;  %v1032_v58 = vpop.f32.mrb[25].mxu1  ;;  %v1103_v61 = vsel %vm1102_vm7, %v1086_v51, 0.0  ;;  %v1087_v36 = vmul.f32 %v2192_v53, %v2874_v8 }
 0x1ef   :  { %v1033_v24 = vadd.f32 %v2862_v7, %v1032_v58  ;;  %v2122_v55 = vpop.f32.mrb[26].mxu1  ;;  %1104 = vadd.xlane.f32.xlu0 %v1103_v61  ;;  %v1112_v11 = vsel %vm1102_vm7, %v1089_v21, 0.0 }
 0x1f0   :  { %2201 = vtanh.f32 %v1041_v56  ;;  %v1044_v62 = vadd.f32 %v2122_v55, %v2862_v7  ;;  %v1035_v48 = vpop.f32.mrb[27].mxu1  ;;  %v1106_v30 = vsel %vm1102_vm7, %v1087_v36, 0.0 }
 0x1f1   :  { %2203 = vtanh.f32 %v1033_v24  ;;  %v1036_v29 = vadd.f32 %v2862_v7, %v1035_v48 }
 0x1f2   :  { %v2194_v13 = vpop.eup %2193  ;;  %2205 = vtanh.f32 %v1044_v62  ;;  %1113 = vadd.xlane.f32.xlu1 %v1112_v11 }
 0x1f3   :  { %v2196_v5 = vpop.eup %2195  ;;  %2207 = vtanh.f32 %v1036_v29  ;;  %1107 = vadd.xlane.f32.xlu0 %v1106_v30  ;;  %v1092_v20 = vmul.f32 %v2194_v13, %v2874_v8 }
 0x1f4   :  { %v2198_v44 = vpop.eup %2197  ;;  %v1090_v58 = vmul.f32 %v2196_v5, %v2874_v8 }
 0x1f5   :  { %v2200_v51 = vpop.eup %2199  ;;  %v2125_v53 = vpop.f32.mrb[28].mxu1  ;;  %v1121_v18 = vsel %vm1102_vm7, %v1092_v20, 0.0  ;;  %v1093_v22 = vmul.f32 %v2198_v44, %v2874_v8 }
 0x1f6   :  { %v1057_v56 = vadd.f32 %v2125_v53, %v2862_v7  ;;  %v1048_v21 = vpop.f32.mrb[29].mxu1  ;;  %v1091_v55 = vmul.f32 %v2200_v51, %v2874_v8  ;;  %v1115_v13 = vsel %vm1102_vm7, %v1090_v58, 0.0 }
 0x1f7   :  { %v1049_v61 = vadd.f32 %v2862_v7, %v1048_v21  ;;  %1122 = vadd.xlane.f32.xlu0 %v1121_v18  ;;  %v2126_v36 = vpop.f32.mrb[30].mxu1  ;;  %v1124_v24 = vsel %vm1102_vm7, %v1093_v22, 0.0  ;;  %v2275_v22 = vmov 0  }
 0x1f8   :  { %2209 = vtanh.f32 %v1057_v56  ;;  %v1060_v62 = vadd.f32 %v2126_v36, %v2862_v7  ;;  %1125 = vadd.xlane.f32.xlu1 %v1124_v24  ;;  %v1051_v48 = vpop.f32.mrb[31].mxu1  ;;  %v1118_v5 = vsel %vm1102_vm7, %v1091_v55, 0.0  ;;  %2162 = vset.pattern.permute.xlu0 %v2275_v22 }
 0x1f9   :  { %2211 = vtanh.f32 %v1049_v61  ;;  %v1052_v29 = vadd.f32 %v2862_v7, %v1051_v48  ;;  %2161 = vset.pattern.permute.xlu1 %v2275_v22 }
 0x1fa   :  { %v2202_v11 = vpop.eup %2201  ;;  %2213 = vtanh.f32 %v1060_v62 }
 0x1fb   :  { %v2204_v30 = vpop.eup %2203  ;;  %2215 = vtanh.f32 %v1052_v29  ;;  %1116 = vadd.xlane.f32.xlu0 %v1115_v13  ;;  %v1096_v20 = vmul.f32 %v2202_v11, %v2874_v8 }
 0x1fc   :  { %v2206_v44 = vpop.eup %2205  ;;  %1119 = vadd.xlane.f32.xlu1 %v1118_v5  ;;  %v1094_v7 = vmul.f32 %v2204_v30, %v2874_v8 }
 0x1fd   :  { %v2208_v51 = vpop.eup %2207  ;;  %v1133_v53 = vsel %vm1102_vm7, %v1096_v20, 0.0  ;;  %v1097_v18 = vmul.f32 %v2206_v44, %v2874_v8 }
 0x1fe   :  { %v1095_v21 = vmul.f32 %v2208_v51, %v2874_v8  ;;  %v1127_v61 = vsel %vm1102_vm7, %v1094_v7, 0.0  ;;  %v2918_v51 = vsub.s32 7, %v2716_v12 }
 0x1ff   :  { %1134 = vadd.xlane.f32.xlu0 %v1133_v53  ;;  %v1136_v56 = vsel %vm1102_vm7, %v1097_v18, 0.0  ;;  %v1163_v18 = vpop.permute.xlu1 %1162 }
 0x200   :  { %1137 = vadd.xlane.f32.xlu1 %v1136_v56  ;;  %v1130_v24 = vsel %vm1102_vm7, %v1095_v21, 0.0  ;;  %v1233_v53 = vrot.slane %v2721_v1, %v2918_v51  ;;  %v1159_v56 = vpop.permute.xlu0 %1158 }
 0x202   :  { %v2210_v58 = vpop.eup %2209 }
 0x203   :  { %v2212_v36 = vpop.eup %2211  ;;  %1128 = vadd.xlane.f32.xlu0 %v1127_v61  ;;  %v1100_v55 = vmul.f32 %v2210_v58, %v2874_v8  ;;  %v1170_v22 = vpop.permute.xlu1 %1169 }
 0x204   :  { %v2214_v62 = vpop.eup %2213  ;;  %1131 = vadd.xlane.f32.xlu1 %v1130_v24  ;;  %v1098_v13 = vmul.f32 %v2212_v36, %v2874_v8  ;;  %v1181_v21 = vpop.permute.xlu0 %1180 }
 0x205   :  { %v2216_v48 = vpop.eup %2215  ;;  %v1145_v29 = vsel %vm1102_vm7, %v1100_v55, 0.0  ;;  %v1101_v11 = vmul.f32 %v2214_v62, %v2874_v8 }
 0x206   :  { %v1099_v5 = vmul.f32 %v2216_v48, %v2874_v8  ;;  %v1139_v20 = vsel %vm1102_vm7, %v1098_v13, 0.0 }
 0x207   :  { %1146 = vadd.xlane.f32.xlu0 %v1145_v29  ;;  %v1148_v30 = vsel %vm1102_vm7, %v1101_v11, 0.0  ;;  %v1174_v7 = vpop.permute.xlu1 %1173 }
 0x208   :  { %1149 = vadd.xlane.f32.xlu1 %v1148_v30  ;;  %v1142_v44 = vsel %vm1102_vm7, %v1099_v5, 0.0  ;;  %v1192_v61 = vpop.permute.xlu0 %1191 }
 0x20b   :  { %1140 = vadd.xlane.f32.xlu0 %v1139_v20  ;;  %v1185_v8 = vpop.permute.xlu1 %1184 }
 0x20c   :  { %1143 = vadd.xlane.f32.xlu1 %v1142_v44  ;;  %v1203_v24 = vpop.permute.xlu0 %1202 }
 0x20f   :  { %v1196_v58 = vpop.permute.xlu1 %1195 }
 0x210   :  { %v1214_v62 = vpop.permute.xlu0 %1213 }
 0x213   :  { %v1207_v36 = vpop.permute.xlu1 %1206 }
 0x214   :  { %v1225_v29 = vpop.permute.xlu0 %1224 }
 0x217   :  { %v1218_v55 = vpop.permute.xlu1 %1217 }
 0x21b   :  { %v1229_v48 = vpop.permute.xlu1 %1228 }
 0x21d   :  { %1239 = vbcast.lane.b32.xlu1 %v1233_v53, 264 }
 0x221   :  { %1235 = vbcast.lane.b32.xlu0 %v1233_v53, 256 }
 0x27b   :  { %v1111_v11 = vpop.xlane.xlu1 %1110 }
 0x27c   :  { %v2922_v13 = vadd.f32 %v1170_v22, %v1111_v11  ;;  %v1105_v1 = vpop.xlane.xlu0 %1104 }
 0x27d   :  { %v2924_v30 = vadd.f32 %v1159_v56, %v1105_v1 }
 0x27e   :  { %1296 = vperm.xlu1 %2161, %v2922_v13  }
 0x27f   :  { %v1114_v5 = vpop.xlane.xlu1 %1113  ;;  %1290 = vperm.xlu0 %2162, %v2924_v30  }
 0x280   :  { %v2928_v20 = vadd.f32 %v1174_v7, %v1114_v5  ;;  %v1108_v44 = vpop.xlane.xlu0 %1107 }
 0x281   :  { %v2930_v53 = vadd.f32 %v1163_v18, %v1108_v44 }
 0x283   :  { %1293 = vperm.xlu1 %2161, %v2930_v53   ;;  %1299 = vperm.xlu0 %2162, %v2928_v20  }
 0x284   :  { %v1123_v50 = vpop.xlane.xlu0 %1122 }
 0x285   :  { %v2934_v22 = vadd.f32 %v1192_v61, %v1123_v50  ;;  %v1126_v11 = vpop.xlane.xlu1 %1125 }
 0x286   :  { %v2936_v56 = vadd.f32 %v1196_v58, %v1126_v11 }
 0x287   :  { %1308 = vperm.xlu1 %2161, %v2934_v22  }
 0x288   :  { %v1117_v1 = vpop.xlane.xlu0 %1116  ;;  %1311 = vperm.xlu0 %2162, %v2936_v56  }
 0x289   :  { %v2940_v7 = vadd.f32 %v1181_v21, %v1117_v1  ;;  %v1120_v5 = vpop.xlane.xlu1 %1119 }
 0x28a   :  { %v2942_v18 = vadd.f32 %v1185_v8, %v1120_v5 }
 0x28b   :  { %1302 = vperm.xlu1 %2161, %v2940_v7  }
 0x28c   :  { %v1135_v44 = vpop.xlane.xlu0 %1134  ;;  %1305 = vperm.xlu0 %2162, %v2942_v18  }
 0x28d   :  { %v2946_v50 = vadd.f32 %v1214_v62, %v1135_v44  ;;  %v1138_v61 = vpop.xlane.xlu1 %1137 }
 0x28e   :  { %v2948_v58 = vadd.f32 %v1218_v55, %v1138_v61 }
 0x28f   :  { %1320 = vperm.xlu1 %2161, %v2946_v50  }
 0x290   :  { %v1129_v11 = vpop.xlane.xlu0 %1128  ;;  %1323 = vperm.xlu0 %2162, %v2948_v58  }
 0x291   :  { %v2952_v21 = vadd.f32 %v1203_v24, %v1129_v11  ;;  %v1132_v1 = vpop.xlane.xlu1 %1131 }
 0x292   :  { %v2954_v8 = vadd.f32 %v1207_v36, %v1132_v1 }
 0x293   :  { %1314 = vperm.xlu1 %2161, %v2952_v21  }
 0x294   :  { %v1147_v5 = vpop.xlane.xlu0 %1146  ;;  %1317 = vperm.xlu0 %2162, %v2954_v8  }
 0x295   :  { %v1150_v62 = vpop.xlane.xlu1 %1149 }
 0x298   :  { %v1141_v44 = vpop.xlane.xlu0 %1140 }
 0x299   :  { %v2958_v33 = vadd.f32 %v1225_v29, %v1141_v44  ;;  %v1144_v55 = vpop.xlane.xlu1 %1143 }
 0x29a   :  { %v2960_v61 = vadd.f32 %v1229_v48, %v1144_v55 }
 0x29b   :  { %1326 = vperm.xlu1 %2161, %v2958_v33  }
 0x29c   :  { %1329 = vperm.xlu0 %2162, %v2960_v61   ;;  %v1236_v24 = vpop.permute.xlu0 %1235 }
 0x29d   :  { %v2964_v11 = vadd.f32 %v1236_v24, %v1147_v5  ;;  %v1240_v36 = vpop.permute.xlu1 %1239  ;;  %v2972_v5 = vsub.s32 %v1343_v63, %v2716_v12 }
 0x29e   :  { %v2966_v1 = vadd.f32 %v1240_v36, %v1150_v62  ;;  %v2975_v36 = vsub.s32 %v1338_v15, %v2716_v12 }
 0x29f   :  { %1332 = vperm.xlu1 %2161, %v2964_v11  }
 0x2a0   :  { %1335 = vperm.xlu0 %2162, %v2966_v1  }
 0x2fd   :  { %v1297_v43 = vpop.permute.xlu1 %1296 }
 0x2fe   :  { %v1291_v29 = vpop.permute.xlu0 %1290  ;;  %v1353_v46 = vrot.slane %v1297_v43, %v2975_v36 }
 0x2ff   :  { %v1342_v28 = vrot.slane %v1291_v29, %v2975_v36 }
 0x302   :  { %v1294_v44 = vpop.permute.xlu1 %1293  ;;  %v1300_v49 = vpop.permute.xlu0 %1299 }
 0x303   :  { %v1347_v17 = vrot.slane %v1294_v44, %v2972_v5  ;;  %v1357_v25 = vrot.slane %v1300_v49, %v2972_v5 }
 0x305   :  { %v1349_v37 = vsel %vm1348_vm8, %v1347_v17, %v1342_v28  ;;  %v1358_v12 = vsel %vm1348_vm8, %v1357_v25, %v1353_v46 }
 0x306   :  { %v1309_v48 = vpop.permute.xlu1 %1308  ;;  %v1414_v29 = vsel %vm1413_vm9, %v1358_v12, %v1349_v37 }
 0x307   :  { %v1312_v55 = vpop.permute.xlu0 %1311 }
 0x308   :  { %v1375_v43 = vrot.slane %v1312_v55, %v2972_v5 }
 0x30a   :  { %v1303_v9 = vpop.permute.xlu1 %1302 }
 0x30b   :  { %v1306_v16 = vpop.permute.xlu0 %1305  ;;  %v1362_v23 = vrot.slane %v1303_v9, %v2975_v36 }
 0x30c   :  { %v1366_v38 = vrot.slane %v1306_v16, %v2972_v5  ;;  %v1371_v16 = vrot.slane %v1309_v48, %v2975_v36 }
 0x30e   :  { %v1321_v62 = vpop.permute.xlu1 %1320  ;;  %v1367_v15 = vsel %vm1348_vm8, %v1366_v38, %v1362_v23  ;;  %v1376_v25 = vsel %vm1348_vm8, %v1375_v43, %v1371_v16 }
 0x30f   :  { %v1324_v24 = vpop.permute.xlu0 %1323  ;;  %v1416_v44 = vsel %vm1415_vm10, %v1367_v15, %v1414_v29 }
 0x310   :  { %v1393_v48 = vrot.slane %v1324_v24, %v2972_v5  ;;  %v1418_v37 = vsel %vm1417_vm11, %v1376_v25, %v1416_v44 }
 0x312   :  { %v1315_v63 = vpop.permute.xlu1 %1314 }
 0x313   :  { %v1318_v59 = vpop.permute.xlu0 %1317  ;;  %v1380_v49 = vrot.slane %v1315_v63, %v2975_v36 }
 0x314   :  { %v1384_v9 = vrot.slane %v1318_v59, %v2972_v5  ;;  %v1389_v59 = vrot.slane %v1321_v62, %v2975_v36 }
 0x316   :  { %v1385_v28 = vsel %vm1348_vm8, %v1384_v9, %v1380_v49  ;;  %v1394_v9 = vsel %vm1348_vm8, %v1393_v48, %v1389_v59 }
 0x317   :  { %v1420_v38 = vsel %vm1419_vm12, %v1385_v28, %v1418_v37 }
 0x318   :  { %v1422_v24 = vsel %vm1421_vm13, %v1394_v9, %v1420_v38 }
 0x31a   :  { %v1327_v17 = vpop.permute.xlu1 %1326 }
 0x31b   :  { %v1398_v46 = vrot.slane %v1327_v17, %v2975_v36  ;;  %v1330_v23 = vpop.permute.xlu0 %1329 }
 0x31c   :  { %v1402_v55 = vrot.slane %v1330_v23, %v2972_v5 }
 0x31e   :  { %v1333_v63 = vpop.permute.xlu1 %1332  ;;  %v1403_v12 = vsel %vm1348_vm8, %v1402_v55, %v1398_v46 }
 0x31f   :  { %v1407_v15 = vrot.slane %v1333_v63, %v2975_v36  ;;  %v1336_v49 = vpop.permute.xlu0 %1335  ;;  %v1424_v43 = vsel %vm1423_vm14, %v1403_v12, %v1422_v24 }
 0x320   :  { %v1411_v62 = vrot.slane %v1336_v49, %v2972_v5 }
 0x322   :  { %v1412_v16 = vsel %vm1348_vm8, %v1411_v62, %v1407_v15 }
 0x323   :  { %v1426_v29 = vsel %vm1425_vm15, %v1412_v16, %v1424_v43 }
 0x324   :  { %v1428_v44 = vsel %vm1102_vm7, %v1426_v29, -inf }
 0x325   :  { %1429 = vmax.xlane.f32.xlu1 %v1428_v44 }
 0x3b2   :  { %v1430_v17 = vpop.xlane.xlu1 %1429 }
 0x3b3   :  { %v1435_v28 = vrot.slane %v1430_v17, %v2724_v14  ;;  %v1439_v23 = vrot.slane %v1430_v17, %v2727_v39  ;;  %v1451_v59 = vrot.slane %v1430_v17, %v2744_v45  ;;  %v3017_v63 = vrot.slane %v1430_v17, %v2918_v51 }
 0x3b4   :  { %v1443_v12 = vrot.slane %v1430_v17, %v2732_v42  ;;  %v1447_v24 = vrot.slane %v1430_v17, %v2739_v31 }
 0x3b5   :  { %v1472_v46 = vsub.f32 %v2924_v30, %v1435_v28  ;;  %v1473_v25 = vsub.f32 %v2930_v53, %v1435_v28  ;;  %v1474_v55 = vsub.f32 %v2922_v13, %v1439_v23  ;;  %v1481_v38 = vsub.f32 %v2954_v8, %v1451_v59 }
 0x3b6   :  { %v1475_v30 = vsub.f32 %v2928_v20, %v1439_v23  ;;  %v1487_v53 = vsub.f32 %v2966_v1, %v3017_v63  ;;  %v1476_v9 = vsub.f32 %v2940_v7, %v1443_v12  ;;  %v1477_v20 = vsub.f32 %v2942_v18, %v1443_v12 }
 0x3b7   :  { %v1488_v48 = vmul.f32 1.442695, %v1472_v46  ;;  %v1490_v37 = vmul.f32 1.442695, %v1473_v25  ;;  %v1492_v15 = vmul.f32 1.442695, %v1474_v55  ;;  %v1478_v7 = vsub.f32 %v2934_v22, %v1447_v24 }
 0x3b8   :  { %v1506_v49 = vmul.f32 1.442695, %v1481_v38  ;;  %v1494_v13 = vmul.f32 1.442695, %v1475_v30  ;;  %v1518_v8 = vmul.f32 1.442695, %v1487_v53  ;;  %v1479_v28 = vsub.f32 %v2936_v56, %v1447_v24 }
 0x3b9   :  { %2217 = vpow2.f32 %v1488_v48  ;;  %v1496_v16 = vmul.f32 1.442695, %v1476_v9  ;;  %v1498_v1 = vmul.f32 1.442695, %v1477_v20  ;;  %v1500_v18 = vmul.f32 1.442695, %v1478_v7 }
 0x3ba   :  { %2219 = vpow2.f32 %v1490_v37  ;;  %v1455_v22 = vrot.slane %v1430_v17, %v2749_v47  ;;  %v1480_v23 = vsub.f32 %v2952_v21, %v1451_v59  ;;  %v1502_v25 = vmul.f32 1.442695, %v1479_v28 }
 0x3bb   :  { %2221 = vpow2.f32 %v1492_v15  ;;  %v1459_v21 = vrot.slane %v1430_v17, %v2754_v52 }
 0x3bc   :  { %2223 = vpow2.f32 %v1506_v49  ;;  %v1482_v56 = vsub.f32 %v2946_v50, %v1455_v22  ;;  %v1504_v37 = vmul.f32 1.442695, %v1480_v23  ;;  %v1483_v59 = vsub.f32 %v2948_v58, %v1455_v22 }
 0x3bd   :  { %2225 = vpow2.f32 %v1494_v13  ;;  %v1484_v15 = vsub.f32 %v2958_v33, %v1459_v21  ;;  %v1485_v53 = vsub.f32 %v2960_v61, %v1459_v21  ;;  %v1486_v58 = vsub.f32 %v2964_v11, %v3017_v63 }
 0x3be   :  { %2227 = vpow2.f32 %v1518_v8  ;;  %v1508_v12 = vmul.f32 1.442695, %v1482_v56  ;;  %v1510_v50 = vmul.f32 1.442695, %v1483_v59 }
 0x3bf   :  { %2229 = vpow2.f32 %v1496_v16  ;;  %v1512_v17 = vmul.f32 1.442695, %v1484_v15  ;;  %v1514_v13 = vmul.f32 1.442695, %v1485_v53  ;;  %v1516_v8 = vmul.f32 1.442695, %v1486_v58 }
 0x3c0   :  { %2231 = vpow2.f32 %v1498_v1 }
 0x3c1   :  { %2233 = vpow2.f32 %v1500_v18 }
 0x3c2   :  { %2235 = vpow2.f32 %v1502_v25 }
 0x3c3   :  { %v3024_v62 = vpop.eup %2217  ;;  %2237 = vpow2.f32 %v1504_v37 }
 0x3c4   :  { %1537 = vperm.xlu0 %2162, %v3024_v62   ;;  %v3029_v43 = vpop.eup %2219  ;;  %2239 = vpow2.f32 %v1508_v12 }
 0x3c5   :  { %v3033_v29 = vpop.eup %2221  ;;  %2241 = vpow2.f32 %v1510_v50 }
 0x3c6   :  { %v3035_v44 = vpop.eup %2223  ;;  %2243 = vpow2.f32 %v1512_v17 }
 0x3c7   :  { %1564 = vperm.xlu1 %2161, %v3035_v44   ;;  %v3040_v46 = vpop.eup %2225  ;;  %2245 = vpow2.f32 %v1514_v13 }
 0x3c8   :  { %1540 = vperm.xlu0 %2162, %v3029_v43   ;;  %v3045_v48 = vpop.eup %2227  ;;  %2247 = vpow2.f32 %v1516_v8 }
 0x3c9   :  { %v3047_v55 = vpop.eup %2229 }
 0x3ca   :  { %v3052_v38 = vpop.eup %2231 }
 0x3cb   :  { %1582 = vperm.xlu1 %2161, %v3045_v48   ;;  %v3057_v30 = vpop.eup %2233 }
 0x3cc   :  { %1543 = vperm.xlu0 %2162, %v3033_v29   ;;  %v3061_v49 = vpop.eup %2235 }
 0x3cd   :  { %v3065_v9 = vpop.eup %2237 }
 0x3ce   :  { %v3070_v33 = vpop.eup %2239 }
 0x3cf   :  { %v3073_v24 = vpop.eup %2241 }
 0x3d0   :  { %1546 = vperm.xlu0 %2162, %v3040_v46   ;;  %v3076_v61 = vpop.eup %2243 }
 0x3d1   :  { %v3079_v20 = vpop.eup %2245 }
 0x3d2   :  { %v3082_v11 = vpop.eup %2247 }
 0x3d4   :  { %1549 = vperm.xlu0 %2162, %v3047_v55  }
 0x3d8   :  { %1552 = vperm.xlu0 %2162, %v3052_v38  }
 0x3dc   :  { %1555 = vperm.xlu0 %2162, %v3057_v30  }
 0x3e0   :  { %1558 = vperm.xlu0 %2162, %v3061_v49  }
 0x3e4   :  { %1561 = vperm.xlu0 %2162, %v3065_v9  }
 0x3e8   :  { %1567 = vperm.xlu0 %2162, %v3070_v33  }
 0x3ec   :  { %1570 = vperm.xlu0 %2162, %v3073_v24  }
 0x3f0   :  { %1573 = vperm.xlu0 %2162, %v3076_v61  }
 0x3f4   :  { %1576 = vperm.xlu0 %2162, %v3079_v20  }
 0x3f8   :  { %1579 = vperm.xlu0 %2162, %v3082_v11  }
 0x443   :  { %v1538_v63 = vpop.permute.xlu0 %1537 }
 0x444   :  { %v1587_v8 = vrot.slane %v1538_v63, %v2975_v36 }
 0x446   :  { %v1565_v59 = vpop.permute.xlu1 %1564 }
 0x447   :  { %v1541_v16 = vpop.permute.xlu0 %1540 }
 0x448   :  { %v1591_v50 = vrot.slane %v1541_v16, %v2972_v5 }
 0x44a   :  { %v1583_v63 = vpop.permute.xlu1 %1582 }
 0x44b   :  { %v1544_v7 = vpop.permute.xlu0 %1543 }
 0x44c   :  { %v1596_v53 = vrot.slane %v1544_v7, %v2975_v36  ;;  %v1592_v7 = vsel %vm1348_vm8, %v1591_v50, %v1587_v8 }
 0x44f   :  { %v1547_v1 = vpop.permute.xlu0 %1546 }
 0x450   :  { %v1600_v21 = vrot.slane %v1547_v1, %v2972_v5 }
 0x452   :  { %v1601_v54 = vsel %vm1348_vm8, %v1600_v21, %v1596_v53 }
 0x453   :  { %v1550_v28 = vpop.permute.xlu0 %1549  ;;  %v1656_v21 = vsel %vm1413_vm9, %v1601_v54, %v1592_v7 }
 0x454   :  { %v1605_v58 = vrot.slane %v1550_v28, %v2975_v36 }
 0x457   :  { %v1553_v18 = vpop.permute.xlu0 %1552 }
 0x458   :  { %v1609_v12 = vrot.slane %v1553_v18, %v2972_v5  ;;  %v1627_v18 = vrot.slane %v1565_v59, %v2972_v5 }
 0x45a   :  { %v1610_v16 = vsel %vm1348_vm8, %v1609_v12, %v1605_v58 }
 0x45b   :  { %v1556_v22 = vpop.permute.xlu0 %1555  ;;  %v1657_v59 = vsel %vm1415_vm10, %v1610_v16, %v1656_v21 }
 0x45c   :  { %v1614_v1 = vrot.slane %v1556_v22, %v2975_v36 }
 0x45f   :  { %v1559_v23 = vpop.permute.xlu0 %1558 }
 0x460   :  { %v1618_v17 = vrot.slane %v1559_v23, %v2972_v5 }
 0x462   :  { %v1619_v23 = vsel %vm1348_vm8, %v1618_v17, %v1614_v1 }
 0x463   :  { %v1562_v25 = vpop.permute.xlu0 %1561  ;;  %v1658_v53 = vsel %vm1417_vm11, %v1619_v23, %v1657_v59 }
 0x464   :  { %v1623_v13 = vrot.slane %v1562_v25, %v2975_v36 }
 0x466   :  { %v1628_v22 = vsel %vm1348_vm8, %v1627_v18, %v1623_v13 }
 0x467   :  { %v1568_v56 = vpop.permute.xlu0 %1567 }
 0x468   :  { %v1632_v28 = vrot.slane %v1568_v56, %v2975_v36  ;;  %v1654_v56 = vrot.slane %v1583_v63, %v2972_v5 }
 0x46b   :  { %v1571_v37 = vpop.permute.xlu0 %1570 }
 0x46c   :  { %v1636_v6 = vrot.slane %v1571_v37, %v2972_v5 }
 0x46e   :  { %v1637_v12 = vsel %vm1348_vm8, %v1636_v6, %v1632_v28 }
 0x46f   :  { %v1574_v15 = vpop.permute.xlu0 %1573 }
 0x470   :  { %v1641_v37 = vrot.slane %v1574_v15, %v2975_v36 }
 0x473   :  { %v1577_v40 = vpop.permute.xlu0 %1576 }
 0x474   :  { %v1645_v25 = vrot.slane %v1577_v40, %v2972_v5  ;;  %v1659_v40 = vsel %vm1419_vm12, %v1628_v22, %v1658_v53 }
 0x475   :  { %v1660_v54 = vsel %vm1421_vm13, %v1637_v12, %v1659_v40 }
 0x476   :  { %v1646_v50 = vsel %vm1348_vm8, %v1645_v25, %v1641_v37 }
 0x477   :  { %v1580_v17 = vpop.permute.xlu0 %1579  ;;  %v1661_v15 = vsel %vm1423_vm14, %v1646_v50, %v1660_v54 }
 0x478   :  { %v1650_v58 = vrot.slane %v1580_v17, %v2975_v36  ;;  %v3226_v17 = vmax.f32 %v2773_v27, 0.0 }
 0x47a   :  { %v1655_v13 = vsel %vm1348_vm8, %v1654_v56, %v1650_v58  ;;  %v3227_v56 = vmax.f32 %v2767_v26, 0.0  ;;  %v3228_v58 = vmax.f32 %v2794_v34, 0.0 }
 0x47b   :  { %v1662_v8 = vsel %vm1425_vm15, %v1655_v13, %v1661_v15  ;;  %v3229_v13 = vmax.f32 %v2788_v10, 0.0 }
 0x47c   :  { %v1664_v6 = vsel %vm1102_vm7, %v1662_v8, 0.0 }
 0x47d   :  { %1665 = vadd.xlane.f32.xlu0 %v1664_v6 }
 0x50a   :  { %v1666_v1 = vpop.xlane.xlu0 %1665 }
 0x50b   :  { %2249 = vrcp.f32 %v1666_v1 }
 0x515   :  { %v2250_v18 = vpop.eup %2249 }
 0x516   :  { %v1688_v5 = vrot.slane %v2250_v18, %v2744_v45  ;;  %v1672_v16 = vrot.slane %v2250_v18, %v2724_v14  ;;  %v1700_v23 = vrot.slane %v2250_v18, %v2918_v51  ;;  %v1676_v63 = vrot.slane %v2250_v18, %v2727_v39 }
 0x518   :  { %v1717_v36 = vmul.f32 %v3065_v9, %v1688_v5  ;;  %v1709_v7 = vmul.f32 %v3024_v62, %v1672_v16  ;;  %v1724_v28 = vmul.f32 %v3045_v48, %v1700_v23  ;;  %v1710_v25 = vmul.f32 %v3029_v43, %v1672_v16 }
 0x519   :  { %v1711_v45 = vmul.f32 %v3033_v29, %v1676_v63  ;;  %v1712_v14 = vmul.f32 %v3040_v46, %v1676_v63  ;;  %v1680_v9 = vrot.slane %v2250_v18, %v2732_v42  ;;  %v1684_v48 = vrot.slane %v2250_v18, %v2739_v31 }
 0x51a   :  { %1767 = vperm.xlu0 %2162, %v1717_v36   ;;  %1727 = vperm.xlu1 %2161, %v1709_v7   ;;  %v1718_v29 = vmul.f32 %v3035_v44, %v1688_v5  ;;  %v1692_v46 = vrot.slane %v2250_v18, %v2749_v47  ;;  %v3233_v5 = vmax.f32 %v2812_v60, 0.0 }
 0x51b   :  { %v1713_v51 = vmul.f32 %v3047_v55, %v1680_v9  ;;  %v1714_v62 = vmul.f32 %v3052_v38, %v1680_v9  ;;  %v1715_v39 = vmul.f32 %v3057_v30, %v1684_v48  ;;  %v1716_v43 = vmul.f32 %v3061_v49, %v1684_v48 }
 0x51c   :  { %v1719_v42 = vmul.f32 %v3070_v33, %v1692_v46  ;;  %v1720_v55 = vmul.f32 %v3073_v24, %v1692_v46  ;;  %v1696_v38 = vrot.slane %v2250_v18, %v2754_v52  ;;  %v1723_v49 = vmul.f32 %v3082_v11, %v1700_v23 }
 0x51d   :  { %v3224_v52 = vmax.f32 %v2770_v4, 0.0  ;;  %v3230_v4 = vmax.f32 %v2821_v0, 0.0  ;;  %v3232_v18 = vmax.f32 %v2791_v57, 0.0 }
 0x51e   :  { %1802 = vperm.xlu0 %2162, %v1724_v28   ;;  %1732 = vperm.xlu1 %2161, %v1710_v25   ;;  %v1721_v31 = vmul.f32 %v3076_v61, %v1696_v38  ;;  %v1722_v30 = vmul.f32 %v3079_v20, %v1696_v38  ;;  %v3225_v61 = vmax.f32 %v2797_v35, 0.0  ;;  %v3231_v35 = vmax.f32 %v2764_v3, 0.0 }
 0x51f   :  { %v3234_v3 = vmax.f32 %v2815_v41, 0.0 }
 0x522   :  { %1737 = vperm.xlu1 %2161, %v1711_v45  }
 0x526   :  { %1742 = vperm.xlu1 %2161, %v1712_v14   ;;  %v3235_v14 = vmax.f32 %v2818_v19, 0.0 }
 0x52a   :  { %1747 = vperm.xlu1 %2161, %v1713_v51  }
 0x52e   :  { %1752 = vperm.xlu1 %2161, %v1714_v62  }
 0x532   :  { %1757 = vperm.xlu1 %2161, %v1715_v39  }
 0x536   :  { %1762 = vperm.xlu1 %2161, %v1716_v43  }
 0x53a   :  { %1772 = vperm.xlu1 %2161, %v1718_v29  }
 0x53e   :  { %1777 = vperm.xlu1 %2161, %v1719_v42  }
 0x542   :  { %1782 = vperm.xlu1 %2161, %v1720_v55  }
 0x546   :  { %1787 = vperm.xlu1 %2161, %v1721_v31  }
 0x54a   :  { %1792 = vperm.xlu1 %2161, %v1722_v30  }
 0x54e   :  { %1797 = vperm.xlu1 %2161, %v1723_v49  }
 0x599   :  { %v1728_v44 = vpop.permute.xlu1 %1727  ;;  %v1768_v20 = vpop.permute.xlu0 %1767 }
 0x59a   :  { %v1805_v6 = vmul.f32 %v1728_v44, %v3231_v35  ;;  %v1813_v26 = vmul.f32 %v1768_v20, %v3233_v5  ;;  %v3236_v44 = vmax.f32 %v2836_v2, 0.0 }
 0x59d   :  { %v1733_v47 = vpop.permute.xlu1 %1732  ;;  %v1803_v30 = vpop.permute.xlu0 %1802 }
 0x59e   :  { %v1806_v11 = vmul.f32 %v1733_v47, %v3226_v17  ;;  %v3237_v47 = vmax.f32 %v2845_v32, 0.0 }
 0x5a0   :  { %v1821_v34 = vadd.f32 %v1806_v11, %v1805_v6  ;;  %v3240_v11 = vld [vmem:[#allocation5_spill] sm:$0xff] }
 0x5a1   :  { %v1738_v21 = vpop.permute.xlu1 %1737 }
 0x5a2   :  { %v1807_v40 = vmul.f32 %v1738_v21, %v3227_v56  ;;  %v1822_v0 = vrot.slane %v1821_v34, 4  ;;  %v3241_v56 = vmax.f32 %v3240_v11, 0.0 }
 0x5a4   :  { %v1823_v39 = vadd.f32 %v1822_v0, %v1821_v34 }
 0x5a5   :  { %v1743_v22 = vpop.permute.xlu1 %1742 }
 0x5a6   :  { %v1808_v12 = vmul.f32 %v1743_v22, %v3224_v52  ;;  %v1824_v49 = vrot.slane %v1823_v39, 2 }
 0x5a8   :  { %v1828_v1 = vadd.f32 %v1808_v12, %v1807_v40 }
 0x5a9   :  { %v1748_v33 = vpop.permute.xlu1 %1747 }
 0x5aa   :  { %v1809_v15 = vmul.f32 %v1748_v33, %v3229_v13  ;;  %v1829_v10 = vrot.slane %v1828_v1, 4 }
 0x5ac   :  { %v1830_v51 = vadd.f32 %v1829_v10, %v1828_v1 }
 0x5ad   :  { %v1753_v37 = vpop.permute.xlu1 %1752 }
 0x5ae   :  { %v1810_v53 = vmul.f32 %v1753_v37, %v3225_v61  ;;  %v1831_v42 = vrot.slane %v1830_v51, 2 }
 0x5b0   :  { %v1835_v16 = vadd.f32 %v1810_v53, %v1809_v15  ;;  %v1832_v33 = vadd.f32 %v1831_v42, %v1830_v51 }
 0x5b1   :  { %v1758_v59 = vpop.permute.xlu1 %1757 }
 0x5b2   :  { %v1811_v27 = vmul.f32 %v1758_v59, %v3232_v18  ;;  %v1836_v28 = vrot.slane %v1835_v16, 4 }
 0x5b4   :  { %v1837_v62 = vadd.f32 %v1836_v28, %v1835_v16 }
 0x5b5   :  { %v1763_v24 = vpop.permute.xlu1 %1762 }
 0x5b6   :  { %v1812_v54 = vmul.f32 %v1763_v24, %v3228_v58  ;;  %v1838_v38 = vrot.slane %v1837_v62, 2  ;;  %v3238_v24 = vld [vmem:[#allocation6_spill] sm:$0xff]  ;;  %v1833_v58 = vrot.slane %v1832_v33, 1 }
 0x5b7   :  { %v3239_v52 = vmax.f32 %v3238_v24, 0.0 }
 0x5b8   :  { %v1842_v7 = vadd.f32 %v1812_v54, %v1811_v27  ;;  %v1839_v61 = vadd.f32 %v1838_v38, %v1837_v62  ;;  %v1834_v18 = vadd.f32 %v1833_v58, %v1832_v33 }
 0x5b9   :  { %v1773_v50 = vpop.permute.xlu1 %1772  ;;  %v1820_v12 = vmul.f32 %v1803_v30, %v3239_v52 }
 0x5ba   :  { %v1814_v8 = vmul.f32 %v1773_v50, %v3230_v4  ;;  %v1843_v63 = vrot.slane %v1842_v7, 4  ;;  %v1825_v50 = vadd.f32 %v1824_v49, %v1823_v39  ;;  %v1840_v15 = vrot.slane %v1839_v61, 1 }
 0x5bc   :  { %v1849_v23 = vadd.f32 %v1814_v8, %v1813_v26  ;;  %v1844_v43 = vadd.f32 %v1843_v63, %v1842_v7  ;;  %v1826_v4 = vrot.slane %v1825_v50, 1  ;;  %v1841_v16 = vadd.f32 %v1840_v15, %v1839_v61 }
 0x5bd   :  { %v1778_v36 = vpop.permute.xlu1 %1777 }
 0x5be   :  { %v1815_v45 = vmul.f32 %v1778_v36, %v3234_v3  ;;  %v1850_v9 = vrot.slane %v1849_v23, 4  ;;  %v1845_v41 = vrot.slane %v1844_v43, 2  ;;  %v1827_v36 = vadd.f32 %v1826_v4, %v1825_v50 }
 0x5c0   :  { %v1851_v46 = vadd.f32 %v1850_v9, %v1849_v23  ;;  %v1846_v20 = vadd.f32 %v1845_v41, %v1844_v43  ;;  %v1885_v28 = vsel %vm1413_vm9, %v1834_v18, %v1827_v36 }
 0x5c1   :  { %v1783_v25 = vpop.permute.xlu1 %1782  ;;  %v1886_v63 = vsel %vm1415_vm10, %v1841_v16, %v1885_v28 }
 0x5c2   :  { %v1816_v57 = vmul.f32 %v1783_v25, %v3235_v14  ;;  %v1852_v22 = vrot.slane %v1851_v46, 2  ;;  %v1847_v8 = vrot.slane %v1846_v20, 1 }
 0x5c4   :  { %v1856_v60 = vadd.f32 %v1816_v57, %v1815_v45  ;;  %v1853_v2 = vadd.f32 %v1852_v22, %v1851_v46  ;;  %v1848_v34 = vadd.f32 %v1847_v8, %v1846_v20 }
 0x5c5   :  { %v1788_v48 = vpop.permute.xlu1 %1787 }
 0x5c6   :  { %v1857_v29 = vrot.slane %v1856_v60, 4  ;;  %v1817_v19 = vmul.f32 %v1788_v48, %v3236_v44  ;;  %v1854_v1 = vrot.slane %v1853_v2, 1  ;;  %v1887_v14 = vsel %vm1417_vm11, %v1848_v34, %v1886_v63 }
 0x5c8   :  { %v1858_v55 = vadd.f32 %v1857_v29, %v1856_v60  ;;  %v1855_v10 = vadd.f32 %v1854_v1, %v1853_v2 }
 0x5c9   :  { %v1793_v31 = vpop.permute.xlu1 %1792 }
 0x5ca   :  { %v1818_v21 = vmul.f32 %v1793_v31, %v3237_v47  ;;  %v1859_v37 = vrot.slane %v1858_v55, 2  ;;  %v1888_v57 = vsel %vm1419_vm12, %v1855_v10, %v1887_v14 }
 0x5cc   :  { %v1863_v59 = vadd.f32 %v1818_v21, %v1817_v19  ;;  %v1860_v54 = vadd.f32 %v1859_v37, %v1858_v55 }
 0x5cd   :  { %v1798_v53 = vpop.permute.xlu1 %1797 }
 0x5ce   :  { %v1864_v17 = vrot.slane %v1863_v59, 4  ;;  %v1819_v40 = vmul.f32 %v1798_v53, %v3241_v56  ;;  %v1861_v27 = vrot.slane %v1860_v54, 1 }
 0x5d0   :  { %v1865_v32 = vadd.f32 %v1864_v17, %v1863_v59  ;;  %v1870_v13 = vadd.f32 %v1820_v12, %v1819_v40  ;;  %v1862_v25 = vadd.f32 %v1861_v27, %v1860_v54 }
 0x5d2   :  { %v1866_v35 = vrot.slane %v1865_v32, 2  ;;  %v1871_v6 = vrot.slane %v1870_v13, 4  ;;  %v1889_v51 = vsel %vm1421_vm13, %v1862_v25, %v1888_v57 }
 0x5d4   :  { %v1867_v5 = vadd.f32 %v1866_v35, %v1865_v32  ;;  %v1872_v26 = vadd.f32 %v1871_v6, %v1870_v13 }
 0x5d6   :  { %v1868_v7 = vrot.slane %v1867_v5, 1  ;;  %v1873_v23 = vrot.slane %v1872_v26, 2 }
 0x5d8   :  { %v1874_v0 = vadd.f32 %v1873_v23, %v1872_v26  ;;  %v1869_v3 = vadd.f32 %v1868_v7, %v1867_v5 }
 0x5da   :  { %v1875_v45 = vrot.slane %v1874_v0, 1  ;;  %v1890_v60 = vsel %vm1423_vm14, %v1869_v3, %v1889_v51 }
 0x5dc   :  { %v1876_v9 = vadd.f32 %v1875_v45, %v1874_v0 }
 0x5de   :  { %v1891_v62 = vsel %vm1425_vm15, %v1876_v9, %v1890_v60 }
 0x5df   :  { %1893 = vst [vmem:[#allocation2] sm:$0xff] %v1891_v62 }
 0x5e0   :  { %2262 = shalt.err (!%p2259_p4)
}
 0x5e1   :  { %s2263_s28 = scalar_lea.hbm %s3199_s7, 128 }
 0x5e2   :  { %p2264_p5 = scmp.ne.s32.totalorder %s3199_s7, %s2263_s28  ;;  %p2267_p6 = scmp.lt.u32.totalorder %s2263_s28, %s3199_s7 }
 0x5e4   :  { %p2269_p7 = pnand %p2267_p6, %p2264_p5 }
 0x5e6   :  { %2272 = shalt.err (!%p2269_p7)
}
 0x5e7   :  { %1903 = dma.vmem_to_hbm [thread:$0]  %s1901_s24, 128, %s3199_s7, [#allocation3]  }
 0x5e8   :  { %2273 = dma.done.wait [#allocation3], 128  }
 0x5e9   :  { %2274 = vsyncadd [#allocation3], 4294967168 }
 0x5ea   :  { %1907 = vsyncpa [#allocation3], 1 }

</bundles_post_ra>
